<compile_context>
chip_gen: v7x
topology: tpu7x:2x2x1
jax: 0.10.0
libtpu: 0.0.40
codegen_flags: <defaults>
</compile_context>

<pallas_src>
import functools

import jax
import jax.numpy as jnp
import numpy as np
from jax import lax
from jax.experimental import pallas as pl
from jax.experimental.pallas import tpu as pltpu

X = 512            # token feature size
NUM_IO = 5         # io pairs per example
Y = X * NUM_IO     # 2560 "extra" (io embedding) feature size
H = 512            # MLP hidden size
OUT = 2            # classifier outputs
OUT_PAD = 128      # lane-dense output slab width (sliced back to OUT outside)


def _decoder_kernel(data_ref, eproj_ref, len_ref,               # (BB,T,X) (BB,H) (BB,1)
                    w1a_ref, w2_ref, b2_ref, w3t_ref,           # attention MLP weights
                    w4_ref, b4_ref, w5_ref, b5_ref,             # final classifier head
                    out_ref):                                   # (BB,OUT_PAD)
    f32 = jnp.float32
    bf16 = jnp.bfloat16

    data = data_ref[...]                          # (BB, T, X) bf16 token embeddings
    BB, T, _ = data.shape
    tokens = data.reshape(BB * T, X)              # layout-free: T % 16 == 0 (wrapper pad)

    # ---- attention MLP over all BB*T token rows (bf16 operands, f32 accumulate) ----
    h1 = jnp.dot(tokens, w1a_ref[...], preferred_element_type=f32)        # (BB*T, H)
    # io-embedding projection (incl. b1) was hoisted out of the kernel; broadcast it
    # over the T tokens of each example.
    h1 = jnp.maximum(h1.reshape(BB, T, H) + eproj_ref[...][:, None, :], 0.0)
    h2 = jnp.maximum(
        jnp.dot(h1.reshape(BB * T, H).astype(bf16), w2_ref[...],
                preferred_element_type=f32) + b2_ref[...], 0.0)           # (BB*T, H)
    # Last attention layer has a single output column -> lane-reduce instead of an
    # N=1 matmul.  b3 omitted: softmax is shift-invariant, so it cannot change the
    # result.
    # TODO(synk): if a bundle dump shows VALU/XLU as the binding slot, pad w3 to
    # (H,128) bf16 and move this contraction onto the MXU (take lane 0).
    logits = jnp.sum(h2.reshape(BB, T, H) * w3t_ref[...], axis=-1)        # (BB, T) f32

    # ---- per-example masked softmax over the ragged token axis (f32); mask is built
    # in-kernel from the (BB,1) lengths vector -- no mask array ever hits HBM.
    col = lax.broadcasted_iota(jnp.int32, (BB, T), 1)
    logits = jnp.where(col < len_ref[...], logits, -1e30)   # finite -> NaN-free if all masked
    m = jnp.max(logits, axis=-1, keepdims=True)
    e = jnp.exp(logits - m)                                  # exactly 0 at masked positions
    denom = jnp.sum(e, axis=-1, keepdims=True)               # >= 1 by construction, never 0
    p = (e * pl.reciprocal(denom, approx=True)).astype(bf16)             # (BB, T)

    # ---- attention-weighted sum of the token embeddings as a batched bf16 MXU
    # contraction (f32 accumulation).
    # TODO(synk): on v5e/v6e, if the MRF-serialized tail shows up in the bundle, swap
    # for the VPU form: jnp.sum(p[:, :, None].astype(f32) * data.astype(f32), axis=1).
    res = jnp.einsum("bqt,btx->bqx", p[:, None, :], data,
                     preferred_element_type=f32).reshape(BB, X)           # (BB, X) f32

    # ---- final classifier head (bf16 weights, f32 accumulation / biases) ----
    h = jnp.maximum(jnp.dot(res.astype(bf16), w4_ref[...],
                            preferred_element_type=f32) + b4_ref[...], 0.0)   # (BB, H)
    out = jnp.dot(h.astype(bf16), w5_ref[...],
                  preferred_element_type=f32) + b5_ref[...]                   # (BB, OUT_PAD)
    out_ref[...] = out


def lgrl_classifier_decoder(io_embed, code_data, lengths, params, *, rows_target=1024):
    """io_embed (B, 5, 512) f32, code_data (B, T, 512) f32, lengths (B,) int32."""
    B, num_io, x = io_embed.shape
    Bc, T, xc = code_data.shape
    assert x == X and num_io == NUM_IO and xc == X and Bc == B
    w1, b1, w2, b2, w3, b3, w4, b4, w5, b5 = params
    del b3  # softmax shift-invariance: the last attention-layer bias is a no-op.

    # Split Linear(X+Y, H): rows acting on the token data vs. on the io embedding.
    w1a, w1b = w1[:X], w1[X:]

    # ---- hoisted io projection: ONE dense (B, Y) @ (Y, H) matmul (+ b1) ------------
    io_flat = io_embed.reshape(B, Y)
    eproj = jnp.dot(io_flat, w1b, preferred_element_type=jnp.float32) + b1    # (B, H)

    # ---- pad T to a multiple of 16 (layout-free reshapes for bf16 and f32) ---------
    T_pad = max(16, -(-T // 16) * 16)

    # ---- batch blocking: BB examples / grid step so BB*T_pad ~= rows_target rows ---
    # BB is a multiple of 8 (clean sublane blocks) unless a single block covers the
    # whole batch; for batches >= 16 we keep G >= 2 so v7x's two TensorCores both work.
    bb = max(1, rows_target // T_pad)
    if bb >= B:
        if B >= 16:
            bb = -(-((B + 1) // 2) // 8) * 8        # ~half the batch, rounded up to 8
        else:
            bb = B                                  # single block == full array dims
    else:
        bb = max(8, (bb // 8) * 8)
    G = -(-B // bb)
    B_pad = G * bb
    pad_b = B_pad - B
    # TODO(synk): for very long sequences, tile T as an extra "arbitrary" grid axis
    # with an online (flash-style) softmax + running weighted sum.

    # Token stream in bf16 (dominant HBM->VMEM stream); everything ragged handled by
    # the in-kernel length mask (padded tokens / padded batch rows have length 0).
    code_p = jnp.pad(code_data, ((0, pad_b), (0, T_pad - T), (0, 0))).astype(jnp.bfloat16)
    eproj_p = jnp.pad(eproj, ((0, pad_b), (0, 0)))                          # (B_pad, H) f32
    len_p = jnp.pad(lengths.astype(jnp.int32), (0, pad_b)).reshape(B_pad, 1)

    # Matmul weights in bf16 (f32 accumulation in-kernel); biases and the logit row
    # vector stay f32.
    w1a_b = w1a.astype(jnp.bfloat16)
    w2_b = w2.astype(jnp.bfloat16)
    w3t = w3.reshape(1, H).astype(jnp.float32)      # (H,1) -> row vector for lane-reduce
    w4_b = w4.astype(jnp.bfloat16)
    # Lane-dense output slab: pad the 2-wide head to 128 lanes, slice in the wrapper.
    w5p_b = jnp.zeros((H, OUT_PAD), jnp.float32).at[:, :OUT].set(w5).astype(jnp.bfloat16)
    b5p = jnp.zeros((1, OUT_PAD), jnp.float32).at[:, :OUT].set(b5)

    weights = (w1a_b, w2_b, b2, w3t, w4_b, b4, w5p_b, b5p)

    def batch2(width):
        return pl.BlockSpec((bb, width), lambda g: (g, 0))

    def const2(arr):
        # Constant index_map -> weights DMA'd once.  pl.Buffered(1) would halve their
        # VMEM footprint (~1.7 MB resident), but at these sizes the saving is noise
        # next to the 32 MiB budget, so the default buffering is kept.
        return pl.BlockSpec(arr.shape, lambda g: (0, 0))

    in_specs = ([pl.BlockSpec((bb, T_pad, X), lambda g: (g, 0, 0)),   # bf16 tokens
                 batch2(H),                                           # hoisted io proj (+b1)
                 batch2(1)]                                           # ragged lengths
                + [const2(w) for w in weights])

    out = pl.pallas_call(
        _decoder_kernel,
        out_shape=jax.ShapeDtypeStruct((B_pad, OUT_PAD), jnp.float32),
        grid_spec=pltpu.PrefetchScalarGridSpec(
            num_scalar_prefetch=0,
            grid=(G,),
            in_specs=in_specs,
            out_specs=pl.BlockSpec((bb, OUT_PAD), lambda g: (g, 0)),
        ),
        compiler_params=pltpu.CompilerParams(
            # independent batch blocks -> can shard across v7x's two TensorCores
            dimension_semantics=("parallel",),
            # ~1.7 MB x2 resident weights + double-buffered bf16 data tiles + f32
            # intermediates at 1024 rows/step stay well under 32 MiB (fits v7x's 64 MiB).
            vmem_limit_bytes=32 * 1024 * 1024,
        ),
    )(code_p, eproj_p, len_p, *weights)

    return out[:B, :OUT]


def init_params(key):
    ks = jax.random.split(key, 10)

    def w(k, shape):
        return jax.random.normal(k, shape, jnp.float32) * 0.02

    return (
        w(ks[0], (X + Y, H)),   # w1 : attention Linear(512 + 2560, 512)
        w(ks[1], (1, H)),       # b1
        w(ks[2], (H, H)),       # w2 : attention Linear(512, 512)
        w(ks[3], (1, H)),       # b2
        w(ks[4], (H, 1)),       # w3 : attention Linear(512, 1)
        w(ks[5], (1, 1)),       # b3
        w(ks[6], (X, H)),       # w4 : final_fc Linear(512, 512)
        w(ks[7], (1, H)),       # b4
        w(ks[8], (H, OUT)),     # w5 : final_fc Linear(512, 2)
        w(ks[9], (1, OUT)),     # b5
    )


def ref_forward(io_embed, code_data, lengths, params):
    """Pure-JAX reference matching the PyTorch module (loop over batches, f32)."""
    w1, b1, w2, b2, w3, b3, w4, b4, w5, b5 = params
    dot = functools.partial(jnp.dot, precision=lax.Precision.HIGHEST)
    B = io_embed.shape[0]
    io_flat = io_embed.reshape(B, -1)
    outs = []
    for bi in range(B):
        L = int(lengths[bi])
        d = code_data[bi, :L]                                     # (L, X)
        e = jnp.broadcast_to(io_flat[bi][None, :], (L, Y))        # (L, Y)
        cat = jnp.concatenate([d, e], axis=1)                     # (L, X+Y)
        h1 = jax.nn.relu(dot(cat, w1) + b1)
        h2 = jax.nn.relu(dot(h1, w2) + b2)
        logit = dot(h2, w3) + b3                                  # (L, 1)
        p = jax.nn.softmax(logit, axis=0)
        res = jnp.sum(p * d, axis=0, keepdims=True)               # (1, X)
        h = jax.nn.relu(dot(res, w4) + b4)
        outs.append(dot(h, w5) + b5)
    return jnp.concatenate(outs, axis=0)                          # (B, OUT)


if __name__ == "__main__":
    key = jax.random.PRNGKey(0)
    k_io, k_code, k_param = jax.random.split(key, 3)

    B, T = 2, 8
    io_embed = jax.random.normal(k_io, (B, NUM_IO, X), jnp.float32)
    code_data = jax.random.normal(k_code, (B, T, X), jnp.float32)
    lengths = jnp.array([8, 5], dtype=jnp.int32)   # ragged "packed sequence" lengths
    params = init_params(k_param)

    logits = lgrl_classifier_decoder(io_embed, code_data, lengths, params)
    jax.block_until_ready(logits)

    expected = ref_forward(io_embed, code_data, lengths, params)
    np.testing.assert_allclose(np.asarray(logits), np.asarray(expected),
                               rtol=1e-2, atol=2e-3)
    print("KERNEL_OK")
</pallas_src>

<mosaic_0001>
module attributes {stable_mosaic.version = 11 : i64} {
  func.func @_decoder_kernel(%arg0: i32, %arg1: memref<2x16x512xbf16, #tpu.memory_space<vmem>>, %arg2: memref<2x512xf32, #tpu.memory_space<vmem>>, %arg3: memref<2x1xi32, #tpu.memory_space<vmem>>, %arg4: memref<512x512xbf16, #tpu.memory_space<vmem>>, %arg5: memref<512x512xbf16, #tpu.memory_space<vmem>>, %arg6: memref<1x512xf32, #tpu.memory_space<vmem>>, %arg7: memref<1x512xf32, #tpu.memory_space<vmem>>, %arg8: memref<512x512xbf16, #tpu.memory_space<vmem>>, %arg9: memref<1x512xf32, #tpu.memory_space<vmem>>, %arg10: memref<512x128xbf16, #tpu.memory_space<vmem>>, %arg11: memref<1x128xf32, #tpu.memory_space<vmem>>, %arg12: memref<2x128xf32, #tpu.memory_space<vmem>>) attributes {dimension_semantics = [#tpu.dimension_semantics<parallel>], iteration_bounds = array<i64: 1>, scalar_prefetch = 0 : i64, scratch_operands = 0 : i64, tpu.core_type = #tpu.core_type<tc>, window_params = [{transform_indices = @transform_0, window_bounds = array<i64: 2, 16, 512>}, {transform_indices = @transform_1, window_bounds = array<i64: 2, 512>}, {transform_indices = @transform_2, window_bounds = array<i64: 2, 1>}, {pipeline_mode = #tpu.pipeline_mode<synchronous>, transform_indices = @transform_3, window_bounds = array<i64: 512, 512>}, {pipeline_mode = #tpu.pipeline_mode<synchronous>, transform_indices = @transform_4, window_bounds = array<i64: 512, 512>}, {pipeline_mode = #tpu.pipeline_mode<synchronous>, transform_indices = @transform_5, window_bounds = array<i64: 1, 512>}, {pipeline_mode = #tpu.pipeline_mode<synchronous>, transform_indices = @transform_6, window_bounds = array<i64: 1, 512>}, {pipeline_mode = #tpu.pipeline_mode<synchronous>, transform_indices = @transform_7, window_bounds = array<i64: 512, 512>}, {pipeline_mode = #tpu.pipeline_mode<synchronous>, transform_indices = @transform_8, window_bounds = array<i64: 1, 512>}, {pipeline_mode = #tpu.pipeline_mode<synchronous>, transform_indices = @transform_9, window_bounds = array<i64: 512, 128>}, {pipeline_mode = #tpu.pipeline_mode<synchronous>, transform_indices = @transform_10, window_bounds = array<i64: 1, 128>}, {transform_indices = @transform_11, window_bounds = array<i64: 2, 128>}]} {
    %c0 = arith.constant 0 : index
    %c0_0 = arith.constant 0 : index
    %c0_1 = arith.constant 0 : index
    %0 = vector.load %arg1[%c0, %c0_0, %c0_1] : memref<2x16x512xbf16, #tpu.memory_space<vmem>>, vector<2x16x512xbf16>
    %1 = vector.shape_cast %0 : vector<2x16x512xbf16> to vector<32x512xbf16>
    %c0_2 = arith.constant 0 : index
    %c0_3 = arith.constant 0 : index
    %2 = vector.load %arg4[%c0_2, %c0_3] : memref<512x512xbf16, #tpu.memory_space<vmem>>, vector<512x512xbf16>
    %cst = arith.constant dense<0.000000e+00> : vector<32x512xf32>
    %3 = tpu.matmul %1, %2, %cst {dimension_numbers = #tpu.dot_dimension_numbers<[1], [0], [0], [1], [0, 0, 1, 1], [], []>} : vector<32x512xbf16>, vector<512x512xbf16>, vector<32x512xf32> -> vector<32x512xf32>
    %4 = vector.shape_cast %3 : vector<32x512xf32> to vector<2x16x512xf32>
    %c0_4 = arith.constant 0 : index
    %c0_5 = arith.constant 0 : index
    %5 = vector.load %arg2[%c0_4, %c0_5] : memref<2x512xf32, #tpu.memory_space<vmem>>, vector<2x512xf32>
    %6 = vector.shape_cast %5 : vector<2x512xf32> to vector<2x1x512xf32>
    %7 = vector.broadcast %6 : vector<2x1x512xf32> to vector<2x16x512xf32>
    %8 = arith.addf %4, %7 : vector<2x16x512xf32>
    %cst_6 = arith.constant 0.000000e+00 : f32
    %9 = vector.broadcast %cst_6 : f32 to vector<2x16x512xf32>
    %10 = arith.maximumf %8, %9 : vector<2x16x512xf32>
    %11 = vector.shape_cast %10 : vector<2x16x512xf32> to vector<32x512xf32>
    %12 = arith.truncf %11 : vector<32x512xf32> to vector<32x512xbf16>
    %c0_7 = arith.constant 0 : index
    %c0_8 = arith.constant 0 : index
    %13 = vector.load %arg5[%c0_7, %c0_8] : memref<512x512xbf16, #tpu.memory_space<vmem>>, vector<512x512xbf16>
    %cst_9 = arith.constant dense<0.000000e+00> : vector<32x512xf32>
    %14 = tpu.matmul %12, %13, %cst_9 {dimension_numbers = #tpu.dot_dimension_numbers<[1], [0], [0], [1], [0, 0, 1, 1], [], []>} : vector<32x512xbf16>, vector<512x512xbf16>, vector<32x512xf32> -> vector<32x512xf32>
    %c0_10 = arith.constant 0 : index
    %c0_11 = arith.constant 0 : index
    %15 = vector.load %arg6[%c0_10, %c0_11] : memref<1x512xf32, #tpu.memory_space<vmem>>, vector<1x512xf32>
    %16 = vector.broadcast %15 : vector<1x512xf32> to vector<32x512xf32>
    %17 = arith.addf %14, %16 : vector<32x512xf32>
    %cst_12 = arith.constant 0.000000e+00 : f32
    %18 = vector.broadcast %cst_12 : f32 to vector<32x512xf32>
    %19 = arith.maximumf %17, %18 : vector<32x512xf32>
    %20 = vector.shape_cast %19 : vector<32x512xf32> to vector<2x16x512xf32>
    %c0_13 = arith.constant 0 : index
    %c0_14 = arith.constant 0 : index
    %21 = vector.load %arg7[%c0_13, %c0_14] : memref<1x512xf32, #tpu.memory_space<vmem>>, vector<1x512xf32>
    %22 = vector.shape_cast %21 : vector<1x512xf32> to vector<1x1x512xf32>
    %23 = vector.broadcast %22 : vector<1x1x512xf32> to vector<2x16x512xf32>
    %24 = arith.mulf %20, %23 : vector<2x16x512xf32>
    %cst_15 = arith.constant dense<0.000000e+00> : vector<2x16xf32>
    %25 = vector.multi_reduction <add>, %24, %cst_15 [2] : vector<2x16x512xf32> to vector<2x16xf32>
    %26 = tpu.iota {dimensions = array<i32: 1>} : vector<2x16xi32>
    %c0_16 = arith.constant 0 : index
    %c0_17 = arith.constant 0 : index
    %27 = vector.load %arg3[%c0_16, %c0_17] : memref<2x1xi32, #tpu.memory_space<vmem>>, vector<2x1xi32>
    %28 = vector.broadcast %27 : vector<2x1xi32> to vector<2x16xi32>
    %29 = arith.cmpi slt, %26, %28 : vector<2x16xi32>
    %cst_18 = arith.constant -1.000000e+30 : f32
    %30 = vector.broadcast %cst_18 : f32 to vector<2x16xf32>
    %31 = arith.select %29, %25, %30 : vector<2x16xi1>, vector<2x16xf32>
    %cst_19 = arith.constant dense<0xFF800000> : vector<2xf32>
    %32 = vector.multi_reduction <maximumf>, %31, %cst_19 [1] : vector<2x16xf32> to vector<2xf32>
    %33 = vector.shape_cast %32 : vector<2xf32> to vector<2x1xf32>
    %34 = vector.broadcast %33 : vector<2x1xf32> to vector<2x16xf32>
    %35 = arith.subf %31, %34 : vector<2x16xf32>
    %36 = math.exp %35 : vector<2x16xf32>
    %cst_20 = arith.constant dense<0.000000e+00> : vector<2xf32>
    %37 = vector.multi_reduction <add>, %36, %cst_20 [1] : vector<2x16xf32> to vector<2xf32>
    %38 = vector.shape_cast %37 : vector<2xf32> to vector<2x1xf32>
    %39 = tpu.reciprocal %38 {approx = true} : vector<2x1xf32> -> vector<2x1xf32>
    %40 = vector.broadcast %39 : vector<2x1xf32> to vector<2x16xf32>
    %41 = arith.mulf %36, %40 : vector<2x16xf32>
    %42 = arith.truncf %41 : vector<2x16xf32> to vector<2x16xbf16>
    %43 = vector.shape_cast %42 : vector<2x16xbf16> to vector<2x1x16xbf16>
    "tpu.trace_start"() <{level = 10 : i32, message = "bqt,btx->bqx"}> : () -> ()
    %cst_21 = arith.constant dense<0.000000e+00> : vector<2x1x512xf32>
    %44 = tpu.matmul %43, %0, %cst_21 {dimension_numbers = #tpu.dot_dimension_numbers<[2], [1], [1], [2], [0, 0, 0, 1, 1, 2], [0], [0]>} : vector<2x1x16xbf16>, vector<2x16x512xbf16>, vector<2x1x512xf32> -> vector<2x1x512xf32>
    "tpu.trace_stop"() : () -> ()
    %45 = vector.shape_cast %44 : vector<2x1x512xf32> to vector<2x512xf32>
    %46 = arith.truncf %45 : vector<2x512xf32> to vector<2x512xbf16>
    %c0_22 = arith.constant 0 : index
    %c0_23 = arith.constant 0 : index
    %47 = vector.load %arg8[%c0_22, %c0_23] : memref<512x512xbf16, #tpu.memory_space<vmem>>, vector<512x512xbf16>
    %cst_24 = arith.constant dense<0.000000e+00> : vector<2x512xf32>
    %48 = tpu.matmul %46, %47, %cst_24 {dimension_numbers = #tpu.dot_dimension_numbers<[1], [0], [0], [1], [0, 0, 1, 1], [], []>} : vector<2x512xbf16>, vector<512x512xbf16>, vector<2x512xf32> -> vector<2x512xf32>
    %c0_25 = arith.constant 0 : index
    %c0_26 = arith.constant 0 : index
    %49 = vector.load %arg9[%c0_25, %c0_26] : memref<1x512xf32, #tpu.memory_space<vmem>>, vector<1x512xf32>
    %50 = vector.broadcast %49 : vector<1x512xf32> to vector<2x512xf32>
    %51 = arith.addf %48, %50 : vector<2x512xf32>
    %cst_27 = arith.constant 0.000000e+00 : f32
    %52 = vector.broadcast %cst_27 : f32 to vector<2x512xf32>
    %53 = arith.maximumf %51, %52 : vector<2x512xf32>
    %54 = arith.truncf %53 : vector<2x512xf32> to vector<2x512xbf16>
    %c0_28 = arith.constant 0 : index
    %c0_29 = arith.constant 0 : index
    %55 = vector.load %arg10[%c0_28, %c0_29] : memref<512x128xbf16, #tpu.memory_space<vmem>>, vector<512x128xbf16>
    %cst_30 = arith.constant dense<0.000000e+00> : vector<2x128xf32>
    %56 = tpu.matmul %54, %55, %cst_30 {dimension_numbers = #tpu.dot_dimension_numbers<[1], [0], [0], [1], [0, 0, 1, 1], [], []>} : vector<2x512xbf16>, vector<512x128xbf16>, vector<2x128xf32> -> vector<2x128xf32>
    %c0_31 = arith.constant 0 : index
    %c0_32 = arith.constant 0 : index
    %57 = vector.load %arg11[%c0_31, %c0_32] : memref<1x128xf32, #tpu.memory_space<vmem>>, vector<1x128xf32>
    %58 = vector.broadcast %57 : vector<1x128xf32> to vector<2x128xf32>
    %59 = arith.addf %56, %58 : vector<2x128xf32>
    %c0_33 = arith.constant 0 : index
    %c0_34 = arith.constant 0 : index
    %60 = vector.load %arg12[%c0_33, %c0_34] : memref<2x128xf32, #tpu.memory_space<vmem>>, vector<2x128xf32>
    tpu.vector_store %arg12[%c0_33, %c0_34], %59 {strides = array<i32>} : memref<2x128xf32, #tpu.memory_space<vmem>>, vector<2x128xf32>,
    return
  }
  func.func @transform_0(%arg0: i32) -> (i32, i32, i32) {
    %c0_i32 = arith.constant 0 : i32
    %c0_i32_0 = arith.constant 0 : i32
    %c0_i32_1 = arith.constant 0 : i32
    return %arg0, %c0_i32, %c0_i32_0 : i32, i32, i32
  }
  func.func @transform_1(%arg0: i32) -> (i32, i32) {
    %c0_i32 = arith.constant 0 : i32
    %c0_i32_0 = arith.constant 0 : i32
    return %arg0, %c0_i32 : i32, i32
  }
  func.func @transform_2(%arg0: i32) -> (i32, i32) {
    %c0_i32 = arith.constant 0 : i32
    %c0_i32_0 = arith.constant 0 : i32
    return %arg0, %c0_i32 : i32, i32
  }
  func.func @transform_3(%arg0: i32) -> (i32, i32) {
    %c0_i32 = arith.constant 0 : i32
    %c0_i32_0 = arith.constant 0 : i32
    %c0_i32_1 = arith.constant 0 : i32
    return %c0_i32, %c0_i32_0 : i32, i32
  }
  func.func @transform_4(%arg0: i32) -> (i32, i32) {
    %c0_i32 = arith.constant 0 : i32
    %c0_i32_0 = arith.constant 0 : i32
    %c0_i32_1 = arith.constant 0 : i32
    return %c0_i32, %c0_i32_0 : i32, i32
  }
  func.func @transform_5(%arg0: i32) -> (i32, i32) {
    %c0_i32 = arith.constant 0 : i32
    %c0_i32_0 = arith.constant 0 : i32
    %c0_i32_1 = arith.constant 0 : i32
    return %c0_i32, %c0_i32_0 : i32, i32
  }
  func.func @transform_6(%arg0: i32) -> (i32, i32) {
    %c0_i32 = arith.constant 0 : i32
    %c0_i32_0 = arith.constant 0 : i32
    %c0_i32_1 = arith.constant 0 : i32
    return %c0_i32, %c0_i32_0 : i32, i32
  }
  func.func @transform_7(%arg0: i32) -> (i32, i32) {
    %c0_i32 = arith.constant 0 : i32
    %c0_i32_0 = arith.constant 0 : i32
    %c0_i32_1 = arith.constant 0 : i32
    return %c0_i32, %c0_i32_0 : i32, i32
  }
  func.func @transform_8(%arg0: i32) -> (i32, i32) {
    %c0_i32 = arith.constant 0 : i32
    %c0_i32_0 = arith.constant 0 : i32
    %c0_i32_1 = arith.constant 0 : i32
    return %c0_i32, %c0_i32_0 : i32, i32
  }
  func.func @transform_9(%arg0: i32) -> (i32, i32) {
    %c0_i32 = arith.constant 0 : i32
    %c0_i32_0 = arith.constant 0 : i32
    %c0_i32_1 = arith.constant 0 : i32
    return %c0_i32, %c0_i32_0 : i32, i32
  }
  func.func @transform_10(%arg0: i32) -> (i32, i32) {
    %c0_i32 = arith.constant 0 : i32
    %c0_i32_0 = arith.constant 0 : i32
    %c0_i32_1 = arith.constant 0 : i32
    return %c0_i32, %c0_i32_0 : i32, i32
  }
  func.func @transform_11(%arg0: i32) -> (i32, i32) {
    %c0_i32 = arith.constant 0 : i32
    %c0_i32_0 = arith.constant 0 : i32
    return %arg0, %c0_i32 : i32, i32
  }
}

</mosaic_0001>

<bundles_post_ra>
// kernel: tpu_custom_call.1
= control target key start
LH: loop header
LB: loop body
LE: loop exit
PB: predicated region body
PF: predicated region fallthrough
CT: control target
= control target key end

     0   :  { %16 = vsyncpa [#allocation3], 0  ;;  %s5524_s0 = inlined_call_operand.hbm [shape: bf16[2,16,512], index: 0, kind: input, shape index: {}]   ;;  %s5525_s1 = inlined_call_operand.hbm [shape: f32[2,512], index: 1, kind: input, shape index: {}]   ;;  %s5526_s2 = inlined_call_operand.vmem [shape: s32[2,1], index: 2, kind: input, shape index: {}]   ;;  %s5527_s3 = inlined_call_operand.hbm [shape: bf16[512,512], index: 3, kind: input, shape index: {}]   ;;  %s5528_s4 = inlined_call_operand.hbm [shape: bf16[512,512], index: 4, kind: input, shape index: {}]   ;;  %s5529_s5 = inlined_call_operand.vmem [shape: f32[1,512], index: 5, kind: input, shape index: {}]   ;;  %s5530_s6 = inlined_call_operand.vmem [shape: f32[1,512], index: 6, kind: input, shape index: {}]   ;;  %s5531_s7 = inlined_call_operand.hbm [shape: bf16[512,512], index: 7, kind: input, shape index: {}]   ;;  %s5532_s8 = inlined_call_operand.vmem [shape: f32[1,512], index: 8, kind: input, shape index: {}]   ;;  %s5533_s9 = inlined_call_operand.hbm [shape: bf16[512,128], index: 9, kind: input, shape index: {}]   ;;  %s5534_s10 = inlined_call_operand.vmem [shape: f32[1,128], index: 10, kind: input, shape index: {}]   ;;  %s5535_s11 = inlined_call_operand.hbm [shape: f32[2,128], index: 11, kind: output, shape index: {}]  }
   0x1   :  { %17 = vsyncpa [#allocation6], 0 }
   0x2   :  { %18 = vsyncpa [#allocation9], 0 }
   0x3   :  { %19 = vsyncpa [#allocation12], 0 }
   0x4   :  { %20 = vsyncpa [#allocation4], 0  ;;  %s5269_s17 = smov [#allocation5]   ;;  %s5105_s21 = scalar_lea.hbm %s5525_s1, 128 }
   0x5   :  { %s39_s18 = sshll.u32 %s5269_s17, 4  ;;  %p5106_p0 = scmp.ne.s32.totalorder %s5525_s1, %s5105_s21  ;;  %s40_s18 = int_to_ptr.vmem [resolvable:$true] %s39_s18 }
   0x6   :  { %p5109_p1 = scmp.lt.u32.totalorder %s5105_s21, %s5525_s1 }
   0x8   :  { %p5111_p2 = pnand %p5109_p1, %p5106_p0 }
   0xa   :  { %5114 = shalt.err (!%p5111_p2)
}
   0xb   :  { %s5115_s26 = scalar_lea.vmem %s40_s18, 128  ;;  %p5120_p4 = scmp.lt.s32.totalorder %s40_s18, %s40_s18 }
   0xc   :  { %p5116_p3 = scmp.ne.s32.totalorder %s40_s18, %s5115_s26  ;;  %p5121_p5 = scmp.lt.s32.totalorder %s5115_s26, %s5115_s26 }
   0xe   :  { %p5122_p6 = por %p5121_p5, %p5120_p4 }
  0x10   :  { %p5123_p7 = pnand %p5122_p6, %p5116_p3 }
  0x12   :  { %5126 = shalt.err (!%p5123_p7)
}
  0x13   :  { %42 = dma.hbm_to_vmem [thread:$0]  %s5525_s1, 128, %s40_s18, [#allocation6]  }
  0x14   :  { %s5270_s29 = smov [#allocation8]   ;;  %s5271_s12 = smov [#allocation2]  }
  0x15   :  { %s62_s30 = sshll.u32 %s5270_s29, 4  ;;  %s26_s13 = sshll.u32 %s5271_s12, 4  ;;  %s63_s30 = int_to_ptr.vmem [resolvable:$true] %s62_s30  ;;  %s27_s13 = int_to_ptr.vmem [resolvable:$true] %s26_s13 }
  0x16   :  { %s5127_s16 = scalar_lea.hbm %s5528_s4, 16384 }
  0x17   :  { %p5128_p8 = scmp.ne.s32.totalorder %s5528_s4, %s5127_s16  ;;  %p5131_p9 = scmp.lt.u32.totalorder %s5127_s16, %s5528_s4 }
  0x19   :  { %p5133_p10 = pnand %p5131_p9, %p5128_p8 }
  0x1b   :  { %5136 = shalt.err (!%p5133_p10)
}
  0x1c   :  { %s5137_s1 = scalar_lea.vmem %s63_s30, 16384  ;;  %p5142_p12 = scmp.lt.s32.totalorder %s63_s30, %s63_s30 }
  0x1d   :  { %p5138_p11 = scmp.ne.s32.totalorder %s63_s30, %s5137_s1  ;;  %p5143_p13 = scmp.lt.s32.totalorder %s5137_s1, %s5137_s1 }
  0x1f   :  { %p5144_p0 = por %p5143_p13, %p5142_p12 }
  0x21   :  { %p5145_p1 = pnand %p5144_p0, %p5138_p11 }
  0x23   :  { %5148 = shalt.err (!%p5145_p1)
}
  0x24   :  { %s5272_s18 = smov 256   ;;  %s5273_s22 = smov 16  }
  0x25   :  { %68 = dma.hbm_to_vmem [thread:$0]  %s5528_s4, 16384, %s63_s30, [#allocation9], %s5272_s18, %s5272_s18, %s5273_s22  }
  0x26   :  { %s5149_s27 = scalar_lea.hbm %s5524_s0, 1024 }
  0x27   :  { %p5150_p2 = scmp.ne.s32.totalorder %s5524_s0, %s5149_s27  ;;  %p5153_p3 = scmp.lt.u32.totalorder %s5149_s27, %s5524_s0 }
  0x29   :  { %p5155_p4 = pnand %p5153_p3, %p5150_p2 }
  0x2b   :  { %5158 = shalt.err (!%p5155_p4)
}
  0x2c   :  { %s5159_s15 = scalar_lea.vmem %s27_s13, 1024  ;;  %p5164_p6 = scmp.lt.s32.totalorder %s27_s13, %s27_s13 }
  0x2d   :  { %p5160_p5 = scmp.ne.s32.totalorder %s27_s13, %s5159_s15  ;;  %p5165_p7 = scmp.lt.s32.totalorder %s5159_s15, %s5159_s15 }
  0x2f   :  { %p5166_p8 = por %p5165_p7, %p5164_p6 }
  0x31   :  { %p5167_p9 = pnand %p5166_p8, %p5160_p5 }
  0x33   :  { %5170 = shalt.err (!%p5167_p9)
}
  0x34   :  { %32 = dma.hbm_to_vmem [thread:$0]  %s5524_s0, 1024, %s27_s13, [#allocation3], %s5272_s18, %s5272_s18, %s5273_s22  }
  0x35   :  { %s5274_s16 = smov [#allocation7]   ;;  %s5275_s19 = smov [#allocation10]  }
  0x36   :  { %s50_s17 = sshll.u32 %s5274_s16, 4  ;;  %s78_s20 = sshll.u32 %s5275_s19, 4  ;;  %s51_s17 = int_to_ptr.vmem [resolvable:$true] %s50_s17  ;;  %s79_s20 = int_to_ptr.vmem [resolvable:$true] %s78_s20 }
  0x37   :  { %s5171_s23 = scalar_lea.hbm %s5527_s3, 16384 }
  0x38   :  { %p5172_p10 = scmp.ne.s32.totalorder %s5527_s3, %s5171_s23  ;;  %p5175_p11 = scmp.lt.u32.totalorder %s5171_s23, %s5527_s3 }
  0x3a   :  { %p5177_p12 = pnand %p5175_p11, %p5172_p10 }
  0x3c   :  { %5180 = shalt.err (!%p5177_p12)
}
  0x3d   :  { %s5181_s0 = scalar_lea.vmem %s51_s17, 16384  ;;  %p5186_p0 = scmp.lt.s32.totalorder %s51_s17, %s51_s17 }
  0x3e   :  { %p5182_p13 = scmp.ne.s32.totalorder %s51_s17, %s5181_s0  ;;  %p5187_p1 = scmp.lt.s32.totalorder %s5181_s0, %s5181_s0 }
  0x40   :  { %p5188_p2 = por %p5187_p1, %p5186_p0 }
  0x42   :  { %p5189_p3 = pnand %p5188_p2, %p5182_p13 }
  0x44   :  { %5192 = shalt.err (!%p5189_p3)
}
  0x45   :  { %56 = dma.hbm_to_vmem [thread:$0]  %s5527_s3, 16384, %s51_s17, [#allocation6], %s5272_s18, %s5272_s18, %s5273_s22  }
  0x46   :  { %s5193_s14 = scalar_lea.hbm %s5531_s7, 16384 }
  0x47   :  { %p5194_p4 = scmp.ne.s32.totalorder %s5531_s7, %s5193_s14  ;;  %p5197_p5 = scmp.lt.u32.totalorder %s5193_s14, %s5531_s7 }
  0x49   :  { %p5199_p6 = pnand %p5197_p5, %p5194_p4 }
  0x4b   :  { %5202 = shalt.err (!%p5199_p6)
}
  0x4c   :  { %s5203_s19 = scalar_lea.vmem %s79_s20, 16384  ;;  %p5208_p8 = scmp.lt.s32.totalorder %s79_s20, %s79_s20 }
  0x4d   :  { %p5204_p7 = scmp.ne.s32.totalorder %s79_s20, %s5203_s19  ;;  %p5209_p9 = scmp.lt.s32.totalorder %s5203_s19, %s5203_s19 }
  0x4f   :  { %p5210_p10 = por %p5209_p9, %p5208_p8 }
  0x51   :  { %p5211_p11 = pnand %p5210_p10, %p5204_p7 }
  0x53   :  { %5214 = shalt.err (!%p5211_p11)
}
  0x54   :  { %84 = dma.hbm_to_vmem [thread:$0]  %s5531_s7, 16384, %s79_s20, [#allocation9], %s5272_s18, %s5272_s18, %s5273_s22  }
  0x55   :  { %s5276_s21 = smov [#allocation11]   ;;  %s5215_s25 = scalar_lea.hbm %s5533_s9, 4096 }
  0x56   :  { %s92_s1 = sshll.u32 %s5276_s21, 4  ;;  %p5216_p12 = scmp.ne.s32.totalorder %s5533_s9, %s5215_s25  ;;  %s93_s1 = int_to_ptr.vmem [resolvable:$true] %s92_s1 }
  0x57   :  { %p5219_p13 = scmp.lt.u32.totalorder %s5215_s25, %s5533_s9 }
  0x59   :  { %p5221_p0 = pnand %p5219_p13, %p5216_p12 }
  0x5b   :  { %5224 = shalt.err (!%p5221_p0)
}
  0x5c   :  { %s5225_s28 = scalar_lea.vmem %s93_s1, 4096  ;;  %p5230_p2 = scmp.lt.s32.totalorder %s93_s1, %s93_s1 }
  0x5d   :  { %p5226_p1 = scmp.ne.s32.totalorder %s93_s1, %s5225_s28  ;;  %p5231_p3 = scmp.lt.s32.totalorder %s5225_s28, %s5225_s28 }
  0x5f   :  { %p5232_p4 = por %p5231_p3, %p5230_p2 }
  0x61   :  { %p5233_p5 = pnand %p5232_p4, %p5226_p1 }
  0x63   :  { %5236 = shalt.err (!%p5233_p5)
}
  0x64   :  { %s5277_s7 = smov 64   ;;  %s5278_s18 = smov 4  }
  0x65   :  { %98 = dma.hbm_to_vmem [thread:$0]  %s5533_s9, 4096, %s93_s1, [#allocation12], %s5277_s7, %s5277_s7, %s5278_s18  }
  0x66   :  { %5259 = dma.done.wait [#allocation3], 1024  }
  0x67   :  { %5260 = vsyncadd [#allocation3], 4294966272 }
  0x68   :  { %5261 = dma.done.wait [#allocation6], 16512  }
  0x69   :  { %5262 = vsyncadd [#allocation6], 4294950784 }
  0x6a   :  { %5263 = dma.done.wait [#allocation9], 32768  }
  0x6b   :  { %5264 = vsyncadd [#allocation9], 4294934528 }
  0x6c   :  { %5265 = dma.done.wait [#allocation12], 4096  }
  0x6d   :  { %5266 = vsyncadd [#allocation12], 4294963200  ;;  %v4473_v0 = vld [vmem:[#allocation7 + $0x4] ss:$16 sps:$4 sm:$0xff]   ;;  %v4475_v1 = vld [vmem:[#allocation7 + $0xc] ss:$16 sps:$4 sm:$0xff]  }
  0x6e   :  { %936 = vmatprep.subr.bf16.mxu0 %v4473_v0  ;;  %v4477_v2 = vld [vmem:[#allocation7] ss:$16 sps:$4 sm:$0xff]   ;;  %v4478_v3 = vld [vmem:[#allocation7 + $0x8] ss:$16 sps:$4 sm:$0xff]   ;;  %1042 = vmatprep.subr.bf16.mxu1 %v4475_v1  ;;  %v4479_v4 = vld [vmem:[#allocation7 + $0x24] ss:$16 sps:$4 sm:$0xff]  }
  0x6f   :  { %937 = vmatpush1.bf16.msra.mxu0 %v4477_v2  ;;  %1043 = vmatpush1.bf16.msra.mxu1 %v4478_v3  ;;  %v4481_v5 = vld [vmem:[#allocation7 + $0x2c] ss:$16 sps:$4 sm:$0xff]   ;;  %v4483_v6 = vld [vmem:[#allocation7 + $0x20] ss:$16 sps:$4 sm:$0xff]   ;;  %v4484_v7 = vld [vmem:[#allocation7 + $0x28] ss:$16 sps:$4 sm:$0xff]  }
  0x70   :  { %938 = vmatprep.subr.bf16.mxu0 %v4479_v4  ;;  %1044 = vmatprep.subr.bf16.mxu1 %v4481_v5  ;;  %v4485_v8 = vld [vmem:[#allocation7 + $0x44] ss:$16 sps:$4 sm:$0xff]   ;;  %v4487_v9 = vld [vmem:[#allocation7 + $0x4c] ss:$16 sps:$4 sm:$0xff]   ;;  %v4489_v10 = vld [vmem:[#allocation7 + $0x40] ss:$16 sps:$4 sm:$0xff]  }
  0x71   :  { %v4490_v11 = vld [vmem:[#allocation7 + $0x48] ss:$16 sps:$4 sm:$0xff]   ;;  %v4491_v12 = vld [vmem:[#allocation7 + $0x64] ss:$16 sps:$4 sm:$0xff]   ;;  %v4493_v13 = vld [vmem:[#allocation7 + $0x6c] ss:$16 sps:$4 sm:$0xff]  }
  0x72   :  { %v4495_v14 = vld [vmem:[#allocation7 + $0x60] ss:$16 sps:$4 sm:$0xff]   ;;  %v4496_v15 = vld [vmem:[#allocation7 + $0x68] ss:$16 sps:$4 sm:$0xff]   ;;  %v4497_v16 = vld [vmem:[#allocation7 + $0x84] ss:$16 sps:$4 sm:$0xff]  }
  0x73   :  { %939 = vmatpush1.bf16.msra.mxu0 %v4483_v6  ;;  %1045 = vmatpush1.bf16.msra.mxu1 %v4484_v7  ;;  %v4499_v17 = vld [vmem:[#allocation7 + $0x8c] ss:$16 sps:$4 sm:$0xff]   ;;  %v4501_v18 = vld [vmem:[#allocation7 + $0x80] ss:$16 sps:$4 sm:$0xff]   ;;  %v4502_v19 = vld [vmem:[#allocation7 + $0x88] ss:$16 sps:$4 sm:$0xff]  }
  0x74   :  { %940 = vmatprep.subr.bf16.mxu0 %v4485_v8  ;;  %1046 = vmatprep.subr.bf16.mxu1 %v4487_v9  ;;  %v4503_v20 = vld [vmem:[#allocation7 + $0xa4] ss:$16 sps:$4 sm:$0xff]   ;;  %v4505_v21 = vld [vmem:[#allocation7 + $0xac] ss:$16 sps:$4 sm:$0xff]   ;;  %v4507_v22 = vld [vmem:[#allocation7 + $0xa0] ss:$16 sps:$4 sm:$0xff]  }
  0x75   :  { %v4508_v23 = vld [vmem:[#allocation7 + $0xa8] ss:$16 sps:$4 sm:$0xff]   ;;  %v4509_v24 = vld [vmem:[#allocation7 + $0xc4] ss:$16 sps:$4 sm:$0xff]   ;;  %v4511_v25 = vld [vmem:[#allocation7 + $0xcc] ss:$16 sps:$4 sm:$0xff]  }
  0x76   :  { %v4513_v26 = vld [vmem:[#allocation7 + $0xc0] ss:$16 sps:$4 sm:$0xff]   ;;  %v4514_v27 = vld [vmem:[#allocation7 + $0xc8] ss:$16 sps:$4 sm:$0xff]   ;;  %v4515_v28 = vld [vmem:[#allocation7 + $0xe4] ss:$16 sps:$4 sm:$0xff]  }
  0x77   :  { %941 = vmatpush1.bf16.msra.mxu0 %v4489_v10  ;;  %1047 = vmatpush1.bf16.msra.mxu1 %v4490_v11  ;;  %v4517_v29 = vld [vmem:[#allocation7 + $0xec] ss:$16 sps:$4 sm:$0xff]   ;;  %v4519_v30 = vld [vmem:[#allocation7 + $0xe0] ss:$16 sps:$4 sm:$0xff]   ;;  %v4520_v31 = vld [vmem:[#allocation7 + $0xe8] ss:$16 sps:$4 sm:$0xff]  }
  0x78   :  { %942 = vmatprep.subr.bf16.mxu0 %v4491_v12  ;;  %1048 = vmatprep.subr.bf16.mxu1 %v4493_v13  ;;  %v4521_v32 = vld [vmem:[#allocation7 + $0x104] ss:$16 sps:$4 sm:$0xff]   ;;  %v4523_v33 = vld [vmem:[#allocation7 + $0x10c] ss:$16 sps:$4 sm:$0xff]   ;;  %v4525_v34 = vld [vmem:[#allocation7 + $0x100] ss:$16 sps:$4 sm:$0xff]  }
  0x79   :  { %v4526_v35 = vld [vmem:[#allocation7 + $0x108] ss:$16 sps:$4 sm:$0xff]   ;;  %v4527_v36 = vld [vmem:[#allocation7 + $0x124] ss:$16 sps:$4 sm:$0xff]   ;;  %v4529_v37 = vld [vmem:[#allocation7 + $0x12c] ss:$16 sps:$4 sm:$0xff]  }
  0x7a   :  { %v4531_v38 = vld [vmem:[#allocation7 + $0x120] ss:$16 sps:$4 sm:$0xff]   ;;  %v4532_v39 = vld [vmem:[#allocation7 + $0x128] ss:$16 sps:$4 sm:$0xff]   ;;  %v4533_v40 = vld [vmem:[#allocation7 + $0x144] ss:$16 sps:$4 sm:$0xff]  }
  0x7b   :  { %943 = vmatpush1.bf16.msra.mxu0 %v4495_v14  ;;  %1049 = vmatpush1.bf16.msra.mxu1 %v4496_v15  ;;  %v4535_v41 = vld [vmem:[#allocation7 + $0x14c] ss:$16 sps:$4 sm:$0xff]   ;;  %v4537_v42 = vld [vmem:[#allocation7 + $0x140] ss:$16 sps:$4 sm:$0xff]   ;;  %v4538_v43 = vld [vmem:[#allocation7 + $0x148] ss:$16 sps:$4 sm:$0xff]  }
  0x7c   :  { %944 = vmatprep.subr.bf16.mxu0 %v4497_v16  ;;  %1050 = vmatprep.subr.bf16.mxu1 %v4499_v17  ;;  %v4539_v44 = vld [vmem:[#allocation7 + $0x164] ss:$16 sps:$4 sm:$0xff]   ;;  %v4541_v45 = vld [vmem:[#allocation7 + $0x16c] ss:$16 sps:$4 sm:$0xff]   ;;  %v4543_v46 = vld [vmem:[#allocation7 + $0x160] ss:$16 sps:$4 sm:$0xff]  }
  0x7d   :  { %v4569_v47 = vld [vmem:[#allocation2 + $0x4] ss:$16 sps:$4 sm:$0xff]   ;;  %v4544_v48 = vld [vmem:[#allocation7 + $0x168] ss:$16 sps:$4 sm:$0xff]   ;;  %v4545_v49 = vld [vmem:[#allocation7 + $0x184] ss:$16 sps:$4 sm:$0xff]  }
  0x7e   :  { %v4547_v50 = vld [vmem:[#allocation7 + $0x18c] ss:$16 sps:$4 sm:$0xff]   ;;  %968 = vmatprep.mubr.bf16.mxu0 %v4569_v47  ;;  %1074 = vmatprep.mubr.bf16.mxu1 %v4569_v47  ;;  %v4549_v51 = vld [vmem:[#allocation7 + $0x180] ss:$16 sps:$4 sm:$0xff]   ;;  %v4550_v52 = vld [vmem:[#allocation7 + $0x188] ss:$16 sps:$4 sm:$0xff]  }
  0x7f   :  { %945 = vmatpush1.bf16.msra.mxu0 %v4501_v18  ;;  %1051 = vmatpush1.bf16.msra.mxu1 %v4502_v19  ;;  %v4551_v53 = vld [vmem:[#allocation7 + $0x1a4] ss:$16 sps:$4 sm:$0xff]   ;;  %v4553_v54 = vld [vmem:[#allocation7 + $0x1ac] ss:$16 sps:$4 sm:$0xff]   ;;  %v4555_v55 = vld [vmem:[#allocation7 + $0x1a0] ss:$16 sps:$4 sm:$0xff]  }
  0x80   :  { %946 = vmatprep.subr.bf16.mxu0 %v4503_v20  ;;  %1052 = vmatprep.subr.bf16.mxu1 %v4505_v21  ;;  %v4556_v56 = vld [vmem:[#allocation7 + $0x1a8] ss:$16 sps:$4 sm:$0xff]   ;;  %v4557_v57 = vld [vmem:[#allocation7 + $0x1c4] ss:$16 sps:$4 sm:$0xff]   ;;  %v4559_v58 = vld [vmem:[#allocation7 + $0x1cc] ss:$16 sps:$4 sm:$0xff]  }
  0x81   :  { %v4561_v59 = vld [vmem:[#allocation7 + $0x1c0] ss:$16 sps:$4 sm:$0xff]   ;;  %v4562_v60 = vld [vmem:[#allocation7 + $0x1c8] ss:$16 sps:$4 sm:$0xff]   ;;  %v4563_v61 = vld [vmem:[#allocation7 + $0x1e4] ss:$16 sps:$4 sm:$0xff]  }
  0x82   :  { %v4565_v62 = vld [vmem:[#allocation7 + $0x1ec] ss:$16 sps:$4 sm:$0xff]   ;;  %v4567_v63 = vld [vmem:[#allocation7 + $0x1e0] ss:$16 sps:$4 sm:$0xff]   ;;  %v4568_v0 = vld [vmem:[#allocation7 + $0x1e8] ss:$16 sps:$4 sm:$0xff]  }
  0x83   :  { %947 = vmatpush1.bf16.msra.mxu0 %v4507_v22  ;;  %1053 = vmatpush1.bf16.msra.mxu1 %v4508_v23  ;;  %v4573_v1 = vld [vmem:[#allocation7 + $0x204] ss:$16 sps:$4 sm:$0xff]   ;;  %v4576_v2 = vld [vmem:[#allocation7 + $0x20c] ss:$16 sps:$4 sm:$0xff]   ;;  %v4571_v3 = vld [vmem:[#allocation7 + $0x200] ss:$16 sps:$4 sm:$0xff]  }
  0x84   :  { %948 = vmatprep.subr.bf16.mxu0 %v4509_v24  ;;  %1054 = vmatprep.subr.bf16.mxu1 %v4511_v25  ;;  %v4574_v4 = vld [vmem:[#allocation7 + $0x208] ss:$16 sps:$4 sm:$0xff]   ;;  %v4580_v6 = vld [vmem:[#allocation7 + $0x224] ss:$16 sps:$4 sm:$0xff]   ;;  %v4583_v7 = vld [vmem:[#allocation7 + $0x22c] ss:$16 sps:$4 sm:$0xff]  }
  0x85   :  { %v4577_v5 = vld [vmem:[#allocation2] ss:$16 sps:$4 sm:$0xff]   ;;  %v4578_v8 = vld [vmem:[#allocation7 + $0x220] ss:$16 sps:$4 sm:$0xff]   ;;  %v4586_v10 = vld [vmem:[#allocation7 + $0x244] ss:$16 sps:$4 sm:$0xff]  }
  0x86   :  { %v4581_v9 = vld [vmem:[#allocation7 + $0x228] ss:$16 sps:$4 sm:$0xff]   ;;  %v4589_v11 = vld [vmem:[#allocation7 + $0x24c] ss:$16 sps:$4 sm:$0xff]   ;;  %v4584_v12 = vld [vmem:[#allocation7 + $0x240] ss:$16 sps:$4 sm:$0xff]  }
  0x87   :  { %949 = vmatpush1.bf16.msra.mxu0 %v4513_v26  ;;  %1055 = vmatpush1.bf16.msra.mxu1 %v4514_v27  ;;  %v4587_v13 = vld [vmem:[#allocation7 + $0x248] ss:$16 sps:$4 sm:$0xff]   ;;  %v4592_v14 = vld [vmem:[#allocation7 + $0x264] ss:$16 sps:$4 sm:$0xff]   ;;  %v4595_v15 = vld [vmem:[#allocation7 + $0x26c] ss:$16 sps:$4 sm:$0xff]  }
  0x88   :  { %950 = vmatprep.subr.bf16.mxu0 %v4515_v28  ;;  %1056 = vmatprep.subr.bf16.mxu1 %v4517_v29  ;;  %v4590_v16 = vld [vmem:[#allocation7 + $0x260] ss:$16 sps:$4 sm:$0xff]   ;;  %v4593_v17 = vld [vmem:[#allocation7 + $0x268] ss:$16 sps:$4 sm:$0xff]   ;;  %v4598_v18 = vld [vmem:[#allocation7 + $0x284] ss:$16 sps:$4 sm:$0xff]  }
  0x89   :  { %v4601_v19 = vld [vmem:[#allocation7 + $0x28c] ss:$16 sps:$4 sm:$0xff]   ;;  %v4596_v20 = vld [vmem:[#allocation7 + $0x280] ss:$16 sps:$4 sm:$0xff]   ;;  %v4599_v21 = vld [vmem:[#allocation7 + $0x288] ss:$16 sps:$4 sm:$0xff]  }
  0x8a   :  { %v4604_v22 = vld [vmem:[#allocation7 + $0x2a4] ss:$16 sps:$4 sm:$0xff]   ;;  %v4607_v23 = vld [vmem:[#allocation7 + $0x2ac] ss:$16 sps:$4 sm:$0xff]   ;;  %v4602_v24 = vld [vmem:[#allocation7 + $0x2a0] ss:$16 sps:$4 sm:$0xff]  }
  0x8b   :  { %951 = vmatpush1.bf16.msra.mxu0 %v4519_v30  ;;  %1057 = vmatpush1.bf16.msra.mxu1 %v4520_v31  ;;  %v4656_v25 = vld [vmem:[#allocation2 + $0x24] ss:$16 sps:$4 sm:$0xff]   ;;  %v4605_v26 = vld [vmem:[#allocation7 + $0x2a8] ss:$16 sps:$4 sm:$0xff]   ;;  %v4610_v28 = vld [vmem:[#allocation7 + $0x2c4] ss:$16 sps:$4 sm:$0xff]  }
  0x8c   :  { %952 = vmatprep.subr.bf16.mxu0 %v4521_v32  ;;  %1058 = vmatprep.subr.bf16.mxu1 %v4523_v33  ;;  %v4658_v27 = vld [vmem:[#allocation2 + $0x20] ss:$16 sps:$4 sm:$0xff]   ;;  %v4613_v29 = vld [vmem:[#allocation7 + $0x2cc] ss:$16 sps:$4 sm:$0xff]   ;;  %v4608_v30 = vld [vmem:[#allocation7 + $0x2c0] ss:$16 sps:$4 sm:$0xff]  }
  0x8d   :  { %v4611_v31 = vld [vmem:[#allocation7 + $0x2c8] ss:$16 sps:$4 sm:$0xff]   ;;  %v4616_v32 = vld [vmem:[#allocation7 + $0x2e4] ss:$16 sps:$4 sm:$0xff]   ;;  %v4619_v33 = vld [vmem:[#allocation7 + $0x2ec] ss:$16 sps:$4 sm:$0xff]  }
  0x8e   :  { %v4632_v47 = vld [vmem:[#allocation7 + $0x340] ss:$16 sps:$4 sm:$0xff]   ;;  %vm2334_vm0 = vcmask 130112   ;;  %vm2345_vm1 = vcmask 1041409   ;;  %vm2349_vm3 = vcmask 123904   ;;  %vm2384_vm4 = vcmask 130048  }
  0x8f   :  { %953 = vmatpush1.bf16.msra.mxu0 %v4525_v34  ;;  %1059 = vmatpush1.bf16.msra.mxu1 %v4526_v35  ;;  %v4673_v34 = vld [vmem:[#allocation2 + $0xc] ss:$16 sps:$4 sm:$0xff]   ;;  %v4614_v35 = vld [vmem:[#allocation7 + $0x2e0] ss:$16 sps:$4 sm:$0xff]   ;;  %s5281_s30 = smov [#allocation13]  }
  0x90   :  { %954 = vmatprep.subr.bf16.mxu0 %v4527_v36  ;;  %1060 = vmatprep.subr.bf16.mxu1 %v4529_v37  ;;  %v4617_v36 = vld [vmem:[#allocation7 + $0x2e8] ss:$16 sps:$4 sm:$0xff]   ;;  %v4622_v37 = vld [vmem:[#allocation7 + $0x304] ss:$16 sps:$4 sm:$0xff]   ;;  %s3912_s16 = sshll.u32 %s5281_s30, 4  ;;  %s3913_s16 = int_to_ptr.vmem [resolvable:$true] %s3912_s16 }
  0x91   :  { %s5237_s19 = scalar_lea.vmem %s3913_s16, 32  ;;  %p5242_p7 = scmp.lt.s32.totalorder %s3913_s16, %s3913_s16 }
  0x92   :  { %p5238_p6 = scmp.ne.s32.totalorder %s3913_s16, %s5237_s19  ;;  %p5243_p8 = scmp.lt.s32.totalorder %s5237_s19, %s5237_s19 }
  0x93   :  { %955 = vmatpush1.bf16.msra.mxu0 %v4531_v38  ;;  %1061 = vmatpush1.bf16.msra.mxu1 %v4532_v39  ;;  %v4625_v38 = vld [vmem:[#allocation7 + $0x30c] ss:$16 sps:$4 sm:$0xff]   ;;  %v4620_v39 = vld [vmem:[#allocation7 + $0x300] ss:$16 sps:$4 sm:$0xff]  }
  0x94   :  { %956 = vmatprep.subr.bf16.mxu0 %v4533_v40  ;;  %1062 = vmatprep.subr.bf16.mxu1 %v4535_v41  ;;  %v4623_v40 = vld [vmem:[#allocation7 + $0x308] ss:$16 sps:$4 sm:$0xff]   ;;  %v4628_v41 = vld [vmem:[#allocation7 + $0x324] ss:$16 sps:$4 sm:$0xff]   ;;  %p5244_p9 = por %p5243_p8, %p5242_p7 }
  0x96   :  { %p5245_p10 = pnand %p5244_p9, %p5238_p6 }
  0x97   :  { %957 = vmatpush1.bf16.msra.mxu0 %v4537_v42  ;;  %1063 = vmatpush1.bf16.msra.mxu1 %v4538_v43  ;;  %v4631_v42 = vld [vmem:[#allocation7 + $0x32c] ss:$16 sps:$4 sm:$0xff]   ;;  %v4626_v43 = vld [vmem:[#allocation7 + $0x320] ss:$16 sps:$4 sm:$0xff]  }
  0x98   :  { %958 = vmatprep.subr.bf16.mxu0 %v4539_v44  ;;  %1064 = vmatprep.subr.bf16.mxu1 %v4541_v45  ;;  %v4629_v44 = vld [vmem:[#allocation7 + $0x328] ss:$16 sps:$4 sm:$0xff]   ;;  %v4634_v45 = vld [vmem:[#allocation7 + $0x344] ss:$16 sps:$4 sm:$0xff]  }
  0x9b   :  { %959 = vmatpush1.bf16.msra.mxu0 %v4543_v46  ;;  %1065 = vmatpush1.bf16.msra.mxu1 %v4544_v48  ;;  %v4637_v46 = vld [vmem:[#allocation7 + $0x34c] ss:$16 sps:$4 sm:$0xff]   ;;  %v4635_v48 = vld [vmem:[#allocation7 + $0x348] ss:$16 sps:$4 sm:$0xff]  }
  0x9c   :  { %960 = vmatprep.subr.bf16.mxu0 %v4545_v49  ;;  %1066 = vmatprep.subr.bf16.mxu1 %v4547_v50  ;;  %v4640_v49 = vld [vmem:[#allocation7 + $0x364] ss:$16 sps:$4 sm:$0xff]   ;;  %v4643_v50 = vld [vmem:[#allocation7 + $0x36c] ss:$16 sps:$4 sm:$0xff]  }
  0x9f   :  { %961 = vmatpush1.bf16.msra.mxu0 %v4549_v51  ;;  %1067 = vmatpush1.bf16.msra.mxu1 %v4550_v52  ;;  %v4638_v51 = vld [vmem:[#allocation7 + $0x360] ss:$16 sps:$4 sm:$0xff]   ;;  %v4641_v52 = vld [vmem:[#allocation7 + $0x368] ss:$16 sps:$4 sm:$0xff]  }
  0xa0   :  { %962 = vmatprep.subr.bf16.mxu0 %v4551_v53  ;;  %1068 = vmatprep.subr.bf16.mxu1 %v4553_v54  ;;  %v4646_v53 = vld [vmem:[#allocation7 + $0x384] ss:$16 sps:$4 sm:$0xff]   ;;  %v4649_v54 = vld [vmem:[#allocation7 + $0x38c] ss:$16 sps:$4 sm:$0xff]  }
  0xa3   :  { %963 = vmatpush1.bf16.msra.mxu0 %v4555_v55  ;;  %1069 = vmatpush1.bf16.msra.mxu1 %v4556_v56  ;;  %v4644_v55 = vld [vmem:[#allocation7 + $0x380] ss:$16 sps:$4 sm:$0xff]   ;;  %v4647_v56 = vld [vmem:[#allocation7 + $0x388] ss:$16 sps:$4 sm:$0xff]  }
  0xa4   :  { %964 = vmatprep.subr.bf16.mxu0 %v4557_v57  ;;  %1070 = vmatprep.subr.bf16.mxu1 %v4559_v58  ;;  %v4652_v57 = vld [vmem:[#allocation7 + $0x3a4] ss:$16 sps:$4 sm:$0xff]   ;;  %v4655_v58 = vld [vmem:[#allocation7 + $0x3ac] ss:$16 sps:$4 sm:$0xff]  }
  0xa7   :  { %965 = vmatpush1.bf16.msra.mxu0 %v4561_v59  ;;  %1071 = vmatpush1.bf16.msra.mxu1 %v4562_v60  ;;  %v4650_v59 = vld [vmem:[#allocation7 + $0x3a0] ss:$16 sps:$4 sm:$0xff]   ;;  %v4653_v60 = vld [vmem:[#allocation7 + $0x3a8] ss:$16 sps:$4 sm:$0xff]  }
  0xa8   :  { %966 = vmatprep.subr.bf16.mxu0 %v4563_v61  ;;  %1072 = vmatprep.subr.bf16.mxu1 %v4565_v62  ;;  %v4661_v61 = vld [vmem:[#allocation7 + $0x3c4] ss:$16 sps:$4 sm:$0xff]   ;;  %v4664_v62 = vld [vmem:[#allocation7 + $0x3cc] ss:$16 sps:$4 sm:$0xff]  }
  0xab   :  { %967 = vmatpush1.bf16.msra.mxu0 %v4567_v63  ;;  %1073 = vmatpush1.bf16.msra.mxu1 %v4568_v0  ;;  %v4659_v63 = vld [vmem:[#allocation7 + $0x3c0] ss:$16 sps:$4 sm:$0xff]   ;;  %v4662_v0 = vld [vmem:[#allocation7 + $0x3c8] ss:$16 sps:$4 sm:$0xff]  }
  0xac   :  { %989 = vmatprep.subr.bf16.mxu0 %v4573_v1  ;;  %1095 = vmatprep.subr.bf16.mxu1 %v4576_v2  ;;  %v4667_v1 = vld [vmem:[#allocation7 + $0x3e4] ss:$16 sps:$4 sm:$0xff]   ;;  %v4670_v2 = vld [vmem:[#allocation7 + $0x3ec] ss:$16 sps:$4 sm:$0xff]  }
  0xae   :  { %969 = vmatmul.mubr.bf16.vlgmr.msra.gmra.mrb[0].mxu0 %v4577_v5  ;;  %1075 = vmatmul.mubr.bf16.vlgmr.msra.gmra.mrb[0].mxu1 %v4577_v5  ;;  %v4679_v5 = vld [vmem:[#allocation8 + $0x4] ss:$16 sps:$4 sm:$0xff]  }
  0xaf   :  { %990 = vmatpush1.bf16.msra.mxu0 %v4571_v3  ;;  %1096 = vmatpush1.bf16.msra.mxu1 %v4574_v4  ;;  %v4665_v3 = vld [vmem:[#allocation7 + $0x3e0] ss:$16 sps:$4 sm:$0xff]   ;;  %v4668_v4 = vld [vmem:[#allocation7 + $0x3e8] ss:$16 sps:$4 sm:$0xff]  }
  0xb0   :  { %991 = vmatprep.subr.bf16.mxu0 %v4580_v6  ;;  %1097 = vmatprep.subr.bf16.mxu1 %v4583_v7  ;;  %v4682_v6 = vld [vmem:[#allocation8 + $0xc] ss:$16 sps:$4 sm:$0xff]   ;;  %v4671_v7 = vld [vmem:[#allocation2 + $0x8] ss:$16 sps:$4 sm:$0xff]  }
  0xb1   :  { %978 = vmatprep.mubr.bf16.mxu0 %v4656_v25  ;;  %1084 = vmatprep.mubr.bf16.mxu1 %v4656_v25  ;;  %v4706_v25 = vld [vmem:[#allocation8 + $0x8c] ss:$16 sps:$4 sm:$0xff]  }
  0xb3   :  { %992 = vmatpush1.bf16.msra.mxu0 %v4578_v8  ;;  %1098 = vmatpush1.bf16.msra.mxu1 %v4581_v9  ;;  %v4674_v8 = vld [vmem:[#allocation2 + $0x2c] ss:$16 sps:$4 sm:$0xff]   ;;  %v4677_v9 = vld [vmem:[#allocation8] ss:$16 sps:$4 sm:$0xff]  }
  0xb4   :  { %993 = vmatprep.subr.bf16.mxu0 %v4586_v10  ;;  %1099 = vmatprep.subr.bf16.mxu1 %v4589_v11  ;;  %v4680_v10 = vld [vmem:[#allocation8 + $0x8] ss:$16 sps:$4 sm:$0xff]   ;;  %v4685_v11 = vld [vmem:[#allocation8 + $0x24] ss:$16 sps:$4 sm:$0xff]  }
  0xb6   :  { %979 = vmatmul.mubr.bf16.gmra.mrb[4].mxu0 %v4658_v27  ;;  %1085 = vmatmul.mubr.bf16.gmra.mrb[4].mxu1 %v4658_v27  ;;  %v4704_v27 = vld [vmem:[#allocation8 + $0x88] ss:$16 sps:$4 sm:$0xff]  }
  0xb7   :  { %994 = vmatpush1.bf16.msra.mxu0 %v4584_v12  ;;  %1100 = vmatpush1.bf16.msra.mxu1 %v4587_v13  ;;  %v4688_v12 = vld [vmem:[#allocation8 + $0x2c] ss:$16 sps:$4 sm:$0xff]   ;;  %v4683_v13 = vld [vmem:[#allocation8 + $0x20] ss:$16 sps:$4 sm:$0xff]  }
  0xb8   :  { %995 = vmatprep.subr.bf16.mxu0 %v4592_v14  ;;  %1101 = vmatprep.subr.bf16.mxu1 %v4595_v15  ;;  %v4686_v14 = vld [vmem:[#allocation8 + $0x28] ss:$16 sps:$4 sm:$0xff]   ;;  %v4691_v15 = vld [vmem:[#allocation8 + $0x44] ss:$16 sps:$4 sm:$0xff]  }
  0xb9   :  { %1021 = vmatprep.mubr.bf16.mxu0 %v4673_v34  ;;  %1127 = vmatprep.mubr.bf16.mxu1 %v4673_v34  ;;  %v4713_v34 = vld [vmem:[#allocation8 + $0xc0] ss:$16 sps:$4 sm:$0xff]  }
  0xbb   :  { %996 = vmatpush1.bf16.msra.mxu0 %v4590_v16  ;;  %1102 = vmatpush1.bf16.msra.mxu1 %v4593_v17  ;;  %v4694_v16 = vld [vmem:[#allocation8 + $0x4c] ss:$16 sps:$4 sm:$0xff]   ;;  %v4676_v17 = vld [vmem:[#allocation2 + $0x28] ss:$16 sps:$4 sm:$0xff]  }
  0xbc   :  { %997 = vmatprep.subr.bf16.mxu0 %v4598_v18  ;;  %1103 = vmatprep.subr.bf16.mxu1 %v4601_v19  ;;  %v4689_v18 = vld [vmem:[#allocation8 + $0x40] ss:$16 sps:$4 sm:$0xff]   ;;  %v4692_v19 = vld [vmem:[#allocation8 + $0x48] ss:$16 sps:$4 sm:$0xff]  }
  0xbf   :  { %998 = vmatpush1.bf16.msra.mxu0 %v4596_v20  ;;  %1104 = vmatpush1.bf16.msra.mxu1 %v4599_v21  ;;  %v4697_v20 = vld [vmem:[#allocation8 + $0x64] ss:$16 sps:$4 sm:$0xff]   ;;  %v4700_v21 = vld [vmem:[#allocation8 + $0x6c] ss:$16 sps:$4 sm:$0xff]  }
  0xc0   :  { %999 = vmatprep.subr.bf16.mxu0 %v4604_v22  ;;  %1105 = vmatprep.subr.bf16.mxu1 %v4607_v23  ;;  %v4695_v22 = vld [vmem:[#allocation8 + $0x60] ss:$16 sps:$4 sm:$0xff]   ;;  %v4698_v23 = vld [vmem:[#allocation8 + $0x68] ss:$16 sps:$4 sm:$0xff]  }
  0xc3   :  { %1000 = vmatpush1.bf16.msra.mxu0 %v4602_v24  ;;  %1106 = vmatpush1.bf16.msra.mxu1 %v4605_v26  ;;  %v4703_v24 = vld [vmem:[#allocation8 + $0x84] ss:$16 sps:$4 sm:$0xff]   ;;  %v4701_v26 = vld [vmem:[#allocation8 + $0x80] ss:$16 sps:$4 sm:$0xff]  }
  0xc4   :  { %1001 = vmatprep.subr.bf16.mxu0 %v4610_v28  ;;  %1107 = vmatprep.subr.bf16.mxu1 %v4613_v29  ;;  %v4709_v28 = vld [vmem:[#allocation8 + $0xa4] ss:$16 sps:$4 sm:$0xff]   ;;  %v4712_v29 = vld [vmem:[#allocation8 + $0xac] ss:$16 sps:$4 sm:$0xff]  }
  0xc7   :  { %1002 = vmatpush1.bf16.msra.mxu0 %v4608_v30  ;;  %1108 = vmatpush1.bf16.msra.mxu1 %v4611_v31  ;;  %v4707_v30 = vld [vmem:[#allocation8 + $0xa0] ss:$16 sps:$4 sm:$0xff]   ;;  %v4710_v31 = vld [vmem:[#allocation8 + $0xa8] ss:$16 sps:$4 sm:$0xff]  }
  0xc8   :  { %1003 = vmatprep.subr.bf16.mxu0 %v4616_v32  ;;  %1109 = vmatprep.subr.bf16.mxu1 %v4619_v33  ;;  %v4715_v32 = vld [vmem:[#allocation8 + $0xc4] ss:$16 sps:$4 sm:$0xff]   ;;  %v4718_v33 = vld [vmem:[#allocation8 + $0xcc] ss:$16 sps:$4 sm:$0xff]  }
  0xcb   :  { %1004 = vmatpush1.bf16.msra.mxu0 %v4614_v35  ;;  %1110 = vmatpush1.bf16.msra.mxu1 %v4617_v36  ;;  %v4716_v35 = vld [vmem:[#allocation8 + $0xc8] ss:$16 sps:$4 sm:$0xff]   ;;  %v4721_v36 = vld [vmem:[#allocation8 + $0xe4] ss:$16 sps:$4 sm:$0xff]  }
  0xcc   :  { %1005 = vmatprep.subr.bf16.mxu0 %v4622_v37  ;;  %1111 = vmatprep.subr.bf16.mxu1 %v4625_v38  ;;  %v4724_v37 = vld [vmem:[#allocation8 + $0xec] ss:$16 sps:$4 sm:$0xff]   ;;  %v4719_v38 = vld [vmem:[#allocation8 + $0xe0] ss:$16 sps:$4 sm:$0xff]  }
  0xcf   :  { %1006 = vmatpush1.bf16.msra.mxu0 %v4620_v39  ;;  %1112 = vmatpush1.bf16.msra.mxu1 %v4623_v40  ;;  %v4722_v39 = vld [vmem:[#allocation8 + $0xe8] ss:$16 sps:$4 sm:$0xff]   ;;  %v4727_v40 = vld [vmem:[#allocation8 + $0x104] ss:$16 sps:$4 sm:$0xff]  }
  0xd0   :  { %1007 = vmatprep.subr.bf16.mxu0 %v4628_v41  ;;  %1113 = vmatprep.subr.bf16.mxu1 %v4631_v42  ;;  %v4730_v41 = vld [vmem:[#allocation8 + $0x10c] ss:$16 sps:$4 sm:$0xff]   ;;  %v4725_v42 = vld [vmem:[#allocation8 + $0x100] ss:$16 sps:$4 sm:$0xff]  }
  0xd3   :  { %1008 = vmatpush1.bf16.msra.mxu0 %v4626_v43  ;;  %1114 = vmatpush1.bf16.msra.mxu1 %v4629_v44  ;;  %v4728_v43 = vld [vmem:[#allocation8 + $0x108] ss:$16 sps:$4 sm:$0xff]   ;;  %v4733_v44 = vld [vmem:[#allocation8 + $0x124] ss:$16 sps:$4 sm:$0xff]  }
  0xd4   :  { %1009 = vmatprep.subr.bf16.mxu0 %v4634_v45  ;;  %1115 = vmatprep.subr.bf16.mxu1 %v4637_v46  ;;  %v4736_v45 = vld [vmem:[#allocation8 + $0x12c] ss:$16 sps:$4 sm:$0xff]   ;;  %v4731_v46 = vld [vmem:[#allocation8 + $0x120] ss:$16 sps:$4 sm:$0xff]  }
  0xd7   :  { %1010 = vmatpush1.bf16.msra.mxu0 %v4632_v47  ;;  %1116 = vmatpush1.bf16.msra.mxu1 %v4635_v48  ;;  %v4734_v47 = vld [vmem:[#allocation8 + $0x128] ss:$16 sps:$4 sm:$0xff]   ;;  %v4739_v48 = vld [vmem:[#allocation8 + $0x144] ss:$16 sps:$4 sm:$0xff]  }
  0xd8   :  { %1011 = vmatprep.subr.bf16.mxu0 %v4640_v49  ;;  %1117 = vmatprep.subr.bf16.mxu1 %v4643_v50  ;;  %v4742_v49 = vld [vmem:[#allocation8 + $0x14c] ss:$16 sps:$4 sm:$0xff]   ;;  %v4737_v50 = vld [vmem:[#allocation8 + $0x140] ss:$16 sps:$4 sm:$0xff]  }
  0xdb   :  { %1012 = vmatpush1.bf16.msra.mxu0 %v4638_v51  ;;  %1118 = vmatpush1.bf16.msra.mxu1 %v4641_v52  ;;  %v4740_v51 = vld [vmem:[#allocation8 + $0x148] ss:$16 sps:$4 sm:$0xff]   ;;  %v4745_v52 = vld [vmem:[#allocation8 + $0x164] ss:$16 sps:$4 sm:$0xff]  }
  0xdc   :  { %1013 = vmatprep.subr.bf16.mxu0 %v4646_v53  ;;  %1119 = vmatprep.subr.bf16.mxu1 %v4649_v54  ;;  %v4748_v53 = vld [vmem:[#allocation8 + $0x16c] ss:$16 sps:$4 sm:$0xff]   ;;  %v4743_v54 = vld [vmem:[#allocation8 + $0x160] ss:$16 sps:$4 sm:$0xff]  }
  0xdf   :  { %1014 = vmatpush1.bf16.msra.mxu0 %v4644_v55  ;;  %1120 = vmatpush1.bf16.msra.mxu1 %v4647_v56  ;;  %v4746_v55 = vld [vmem:[#allocation8 + $0x168] ss:$16 sps:$4 sm:$0xff]   ;;  %v4751_v56 = vld [vmem:[#allocation8 + $0x184] ss:$16 sps:$4 sm:$0xff]  }
  0xe0   :  { %1015 = vmatprep.subr.bf16.mxu0 %v4652_v57  ;;  %1121 = vmatprep.subr.bf16.mxu1 %v4655_v58  ;;  %v4754_v57 = vld [vmem:[#allocation8 + $0x18c] ss:$16 sps:$4 sm:$0xff]   ;;  %v4749_v58 = vld [vmem:[#allocation8 + $0x180] ss:$16 sps:$4 sm:$0xff]  }
  0xe3   :  { %1016 = vmatpush1.bf16.msra.mxu0 %v4650_v59  ;;  %1122 = vmatpush1.bf16.msra.mxu1 %v4653_v60  ;;  %v4752_v59 = vld [vmem:[#allocation8 + $0x188] ss:$16 sps:$4 sm:$0xff]   ;;  %v4757_v60 = vld [vmem:[#allocation8 + $0x1a4] ss:$16 sps:$4 sm:$0xff]  }
  0xe4   :  { %1017 = vmatprep.subr.bf16.mxu0 %v4661_v61  ;;  %1123 = vmatprep.subr.bf16.mxu1 %v4664_v62  ;;  %v4760_v61 = vld [vmem:[#allocation8 + $0x1ac] ss:$16 sps:$4 sm:$0xff]   ;;  %v4755_v62 = vld [vmem:[#allocation8 + $0x1a0] ss:$16 sps:$4 sm:$0xff]  }
  0xe7   :  { %1018 = vmatpush1.bf16.msra.mxu0 %v4659_v63  ;;  %1124 = vmatpush1.bf16.msra.mxu1 %v4662_v0  ;;  %v4758_v63 = vld [vmem:[#allocation8 + $0x1a8] ss:$16 sps:$4 sm:$0xff]   ;;  %v4763_v0 = vld [vmem:[#allocation8 + $0x1c4] ss:$16 sps:$4 sm:$0xff]  }
  0xe8   :  { %1019 = vmatprep.subr.bf16.mxu0 %v4667_v1  ;;  %1125 = vmatprep.subr.bf16.mxu1 %v4670_v2  ;;  %v4766_v1 = vld [vmem:[#allocation8 + $0x1cc] ss:$16 sps:$4 sm:$0xff]   ;;  %v4761_v2 = vld [vmem:[#allocation8 + $0x1c0] ss:$16 sps:$4 sm:$0xff]  }
  0xeb   :  { %1020 = vmatpush1.bf16.msra.mxu0 %v4665_v3  ;;  %1126 = vmatpush1.bf16.msra.mxu1 %v4668_v4  ;;  %v4764_v3 = vld [vmem:[#allocation8 + $0x1c8] ss:$16 sps:$4 sm:$0xff]   ;;  %v4769_v4 = vld [vmem:[#allocation8 + $0x1e4] ss:$16 sps:$4 sm:$0xff]  }
  0xec   :  { %2028 = vmatprep.subr.bf16.mxu0 %v4679_v5  ;;  %2134 = vmatprep.subr.bf16.mxu1 %v4682_v6  ;;  %v4772_v5 = vld [vmem:[#allocation8 + $0x1ec] ss:$16 sps:$4 sm:$0xff]   ;;  %v4767_v6 = vld [vmem:[#allocation8 + $0x1e0] ss:$16 sps:$4 sm:$0xff]  }
  0xee   :  { %1022 = vmatmul.mubr.bf16.vlgmr.msra.gmra.mrb[0].mxu0 %v4671_v7  ;;  %1128 = vmatmul.mubr.bf16.vlgmr.msra.gmra.mrb[0].mxu1 %v4671_v7  ;;  %v4770_v7 = vld [vmem:[#allocation8 + $0x1e8] ss:$16 sps:$4 sm:$0xff]  }
  0xef   :  { %1031 = vmatprep.mubr.bf16.mxu0 %v4674_v8  ;;  %1137 = vmatprep.mubr.bf16.mxu1 %v4674_v8  ;;  %v4775_v8 = vld [vmem:[#allocation8 + $0x204] ss:$16 sps:$4 sm:$0xff]  }
  0xf0   :  { %2029 = vmatpush1.bf16.msra.mxu0 %v4677_v9  ;;  %2135 = vmatpush1.bf16.msra.mxu1 %v4680_v10  ;;  %v4778_v9 = vld [vmem:[#allocation8 + $0x20c] ss:$16 sps:$4 sm:$0xff]   ;;  %v1158_v10 = vlaneseq }
  0xf1   :  { %2030 = vmatprep.subr.bf16.mxu0 %v4685_v11  ;;  %2136 = vmatprep.subr.bf16.mxu1 %v4688_v12 }
  0xf2   :  { %v5427_v11 = vshrl.u32 %v1158_v10, 7 }
  0xf4   :  { %2031 = vmatpush1.bf16.msra.mxu0 %v4683_v13  ;;  %2137 = vmatpush1.bf16.msra.mxu1 %v4686_v14  ;;  %v5430_v12 = vsub.s32 0, %v5427_v11  ;;  %v5433_v13 = vsub.s32 2, %v5427_v11  ;;  %v4060_v14 = vld.sshfl [vmem:[#allocation5] sm:$0xff pattern:$0x75316420] }
  0xf5   :  { %2032 = vmatprep.subr.bf16.mxu0 %v4691_v15  ;;  %2138 = vmatprep.subr.bf16.mxu1 %v4694_v16  ;;  %v5436_v15 = vsub.s32 1, %v5427_v11  ;;  %v5439_v16 = vsub.s32 3, %v5427_v11 }
  0xf6   :  { %1032 = vmatmul.mubr.bf16.gmra.mrb[4].mxu0 %v4676_v17  ;;  %1138 = vmatmul.mubr.bf16.gmra.mrb[4].mxu1 %v4676_v17  ;;  %v1161_v17 = vrot.slane %v4060_v14, %v5430_v12 }
  0xf8   :  { %2033 = vmatpush1.bf16.msra.mxu0 %v4689_v18  ;;  %2139 = vmatpush1.bf16.msra.mxu1 %v4692_v19  ;;  %v1169_v18 = vrot.slane %v4060_v14, %v5433_v13  ;;  %v1165_v19 = vrot.slane %v4060_v14, %v5436_v15 }
  0xf9   :  { %2034 = vmatprep.subr.bf16.mxu0 %v4697_v20  ;;  %2140 = vmatprep.subr.bf16.mxu1 %v4700_v21  ;;  %v1173_v20 = vrot.slane %v4060_v14, %v5439_v16  ;;  %v1157_v21 = vcombine.high %v4060_v14, %v4060_v14 }
  0xfc   :  { %2035 = vmatpush1.bf16.msra.mxu0 %v4695_v22  ;;  %2141 = vmatpush1.bf16.msra.mxu1 %v4698_v23 }
  0xfd   :  { %2036 = vmatprep.subr.bf16.mxu0 %v4703_v24  ;;  %2142 = vmatprep.subr.bf16.mxu1 %v4706_v25 }
 0x100   :  { %2037 = vmatpush1.bf16.msra.mxu0 %v4701_v26  ;;  %2143 = vmatpush1.bf16.msra.mxu1 %v4704_v27 }
 0x101   :  { %2038 = vmatprep.subr.bf16.mxu0 %v4709_v28  ;;  %2144 = vmatprep.subr.bf16.mxu1 %v4712_v29 }
 0x104   :  { %2039 = vmatpush1.bf16.msra.mxu0 %v4707_v30  ;;  %2145 = vmatpush1.bf16.msra.mxu1 %v4710_v31 }
 0x105   :  { %2040 = vmatprep.subr.bf16.mxu0 %v4715_v32  ;;  %2146 = vmatprep.subr.bf16.mxu1 %v4718_v33 }
 0x108   :  { %2041 = vmatpush1.bf16.msra.mxu0 %v4713_v34  ;;  %2147 = vmatpush1.bf16.msra.mxu1 %v4716_v35 }
 0x109   :  { %2042 = vmatprep.subr.bf16.mxu0 %v4721_v36  ;;  %2148 = vmatprep.subr.bf16.mxu1 %v4724_v37  ;;  %v1177_v36 = vrot.slane %v1157_v21, %v5430_v12  ;;  %v1181_v37 = vrot.slane %v1157_v21, %v5436_v15 }
 0x10c   :  { %2043 = vmatpush1.bf16.msra.mxu0 %v4719_v38  ;;  %2149 = vmatpush1.bf16.msra.mxu1 %v4722_v39 }
 0x10d   :  { %2044 = vmatprep.subr.bf16.mxu0 %v4727_v40  ;;  %2150 = vmatprep.subr.bf16.mxu1 %v4730_v41  ;;  %v1185_v40 = vrot.slane %v1157_v21, %v5433_v13  ;;  %v1189_v41 = vrot.slane %v1157_v21, %v5439_v16 }
 0x110   :  { %2045 = vmatpush1.bf16.msra.mxu0 %v4725_v42  ;;  %2151 = vmatpush1.bf16.msra.mxu1 %v4728_v43 }
 0x111   :  { %2046 = vmatprep.subr.bf16.mxu0 %v4733_v44  ;;  %2152 = vmatprep.subr.bf16.mxu1 %v4736_v45 }
 0x114   :  { %2047 = vmatpush1.bf16.msra.mxu0 %v4731_v46  ;;  %2153 = vmatpush1.bf16.msra.mxu1 %v4734_v47 }
 0x115   :  { %2048 = vmatprep.subr.bf16.mxu0 %v4739_v48  ;;  %2154 = vmatprep.subr.bf16.mxu1 %v4742_v49 }
 0x118   :  { %2049 = vmatpush1.bf16.msra.mxu0 %v4737_v50  ;;  %2155 = vmatpush1.bf16.msra.mxu1 %v4740_v51 }
 0x119   :  { %2050 = vmatprep.subr.bf16.mxu0 %v4745_v52  ;;  %2156 = vmatprep.subr.bf16.mxu1 %v4748_v53 }
 0x11c   :  { %2051 = vmatpush1.bf16.msra.mxu0 %v4743_v54  ;;  %2157 = vmatpush1.bf16.msra.mxu1 %v4746_v55  ;;  %v4773_v55 = vld [vmem:[#allocation8 + $0x200] ss:$16 sps:$4 sm:$0xff]  }
 0x11d   :  { %2052 = vmatprep.subr.bf16.mxu0 %v4751_v56  ;;  %2158 = vmatprep.subr.bf16.mxu1 %v4754_v57  ;;  %v4776_v56 = vld [vmem:[#allocation8 + $0x208] ss:$16 sps:$4 sm:$0xff]  }
 0x120   :  { %2053 = vmatpush1.bf16.msra.mxu0 %v4749_v58  ;;  %2159 = vmatpush1.bf16.msra.mxu1 %v4752_v59 }
 0x121   :  { %2054 = vmatprep.subr.bf16.mxu0 %v4757_v60  ;;  %2160 = vmatprep.subr.bf16.mxu1 %v4760_v61  ;;  %v4781_v60 = vld [vmem:[#allocation8 + $0x224] ss:$16 sps:$4 sm:$0xff]   ;;  %v4784_v61 = vld [vmem:[#allocation8 + $0x22c] ss:$16 sps:$4 sm:$0xff]  }
 0x124   :  { %2055 = vmatpush1.bf16.msra.mxu0 %v4755_v62  ;;  %2161 = vmatpush1.bf16.msra.mxu1 %v4758_v63 }
 0x125   :  { %2056 = vmatprep.subr.bf16.mxu0 %v4763_v0  ;;  %2162 = vmatprep.subr.bf16.mxu1 %v4766_v1 }
 0x128   :  { %2057 = vmatpush1.bf16.msra.mxu0 %v4761_v2  ;;  %2163 = vmatpush1.bf16.msra.mxu1 %v4764_v3 }
 0x129   :  { %2058 = vmatprep.subr.bf16.mxu0 %v4769_v4  ;;  %2164 = vmatprep.subr.bf16.mxu1 %v4772_v5 }
 0x12c   :  { %2059 = vmatpush1.bf16.msra.mxu0 %v4767_v6  ;;  %2165 = vmatpush1.bf16.msra.mxu1 %v4770_v7  ;;  %v4779_v6 = vld [vmem:[#allocation8 + $0x220] ss:$16 sps:$4 sm:$0xff]  }
 0x12d   :  { %2081 = vmatprep.subr.bf16.mxu0 %v4775_v8  ;;  %2187 = vmatprep.subr.bf16.mxu1 %v4778_v9 }
 0x1c1   :  { %v1023_v22 = vpop.f32.mrb[0].mxu0  ;;  %v1129_v23 = vpop.f32.mrb[0].mxu1 }
 0x1c2   :  { %v1198_v24 = vadd.f32 %v1161_v17, %v1023_v22  ;;  %v1200_v25 = vadd.f32 %v1169_v18, %v1129_v23  ;;  %v1025_v26 = vpop.f32.mrb[1].mxu0  ;;  %v1131_v27 = vpop.f32.mrb[1].mxu1  ;;  %v4790_v23 = vld [vmem:[#allocation8 + $0x24c] ss:$16 sps:$4 sm:$0xff]  }
 0x1c3   :  { %v1199_v28 = vadd.f32 %v1165_v19, %v1025_v26  ;;  %v1201_v29 = vadd.f32 %v1173_v20, %v1131_v27  ;;  %v1027_v30 = vpop.f32.mrb[2].mxu0  ;;  %v1133_v31 = vpop.f32.mrb[2].mxu1 }
 0x1c4   :  { %v1202_v32 = vadd.f32 %v1161_v17, %v1027_v30  ;;  %v1204_v33 = vadd.f32 %v1169_v18, %v1133_v31  ;;  %v1029_v34 = vpop.f32.mrb[3].mxu0  ;;  %v1135_v35 = vpop.f32.mrb[3].mxu1  ;;  %v1214_v42 = vmax.f32 %v1198_v24, 0.0  ;;  %v1216_v43 = vmax.f32 %v1200_v25, 0.0  ;;  %v4782_v17 = vld [vmem:[#allocation8 + $0x228] ss:$16 sps:$4 sm:$0xff]  }
 0x1c5   :  { %v1203_v38 = vadd.f32 %v1165_v19, %v1029_v34  ;;  %v1205_v39 = vadd.f32 %v1173_v20, %v1135_v35  ;;  %v1215_v46 = vmax.f32 %v1199_v28, 0.0  ;;  %v1217_v47 = vmax.f32 %v1201_v29, 0.0  ;;  %v4787_v18 = vld [vmem:[#allocation8 + $0x244] ss:$16 sps:$4 sm:$0xff]   ;;  %v4785_v31 = vld [vmem:[#allocation8 + $0x240] ss:$16 sps:$4 sm:$0xff]  }
 0x1c6   :  { %v1218_v44 = vmax.f32 %v1202_v32, 0.0  ;;  %v1220_v45 = vmax.f32 %v1204_v33, 0.0  ;;  %v4788_v32 = vld [vmem:[#allocation8 + $0x248] ss:$16 sps:$4 sm:$0xff]   ;;  %v4793_v34 = vld [vmem:[#allocation8 + $0x264] ss:$16 sps:$4 sm:$0xff]  }
 0x1c7   :  { %v1219_v48 = vmax.f32 %v1203_v38, 0.0  ;;  %v1221_v49 = vmax.f32 %v1205_v39, 0.0  ;;  %v4796_v35 = vld [vmem:[#allocation8 + $0x26c] ss:$16 sps:$4 sm:$0xff]   ;;  %v4799_v38 = vld [vmem:[#allocation8 + $0x284] ss:$16 sps:$4 sm:$0xff]  }
 0x1c8   :  { %v1230_v50 = vpack.c.bf16 %v1218_v44, %v1214_v42  ;;  %v5449_v51 = vpack.c.bf16 %v1220_v45, %v1216_v43  ;;  %v4802_v39 = vld [vmem:[#allocation8 + $0x28c] ss:$16 sps:$4 sm:$0xff]   ;;  %v4805_v42 = vld [vmem:[#allocation8 + $0x2a4] ss:$16 sps:$4 sm:$0xff]   ;;  %v4803_v44 = vld [vmem:[#allocation8 + $0x2a0] ss:$16 sps:$4 sm:$0xff]  }
 0x1c9   :  { %v1231_v52 = vpack.c.bf16 %v1219_v48, %v1215_v46  ;;  %v1233_v53 = vpack.c.bf16 %v1221_v49, %v1217_v47  ;;  %v1033_v54 = vpop.f32.mrb[4].mxu0  ;;  %v1139_v57 = vpop.f32.mrb[4].mxu1  ;;  %v4808_v43 = vld [vmem:[#allocation8 + $0x2ac] ss:$16 sps:$4 sm:$0xff]   ;;  %v4806_v45 = vld [vmem:[#allocation8 + $0x2a8] ss:$16 sps:$4 sm:$0xff]  }
 0x1ca   :  { %v1206_v58 = vadd.f32 %v1177_v36, %v1033_v54  ;;  %v1035_v59 = vpop.f32.mrb[5].mxu0  ;;  %v1208_v62 = vadd.f32 %v1185_v40, %v1139_v57  ;;  %v1141_v63 = vpop.f32.mrb[5].mxu1  ;;  %v4811_v46 = vld [vmem:[#allocation8 + $0x2c4] ss:$16 sps:$4 sm:$0xff]   ;;  %v4814_v47 = vld [vmem:[#allocation8 + $0x2cc] ss:$16 sps:$4 sm:$0xff]  }
 0x1cb   :  { %v1207_v0 = vadd.f32 %v1181_v37, %v1035_v59  ;;  %v1037_v1 = vpop.f32.mrb[6].mxu0  ;;  %2060 = vmatprep.mubr.bf16.mxu0 %v1231_v52  ;;  %2166 = vmatprep.mubr.bf16.mxu1 %v1231_v52  ;;  %v1209_v2 = vadd.f32 %v1189_v41, %v1141_v63  ;;  %v1143_v3 = vpop.f32.mrb[6].mxu1  ;;  %v4809_v48 = vld [vmem:[#allocation8 + $0x2c0] ss:$16 sps:$4 sm:$0xff]   ;;  %v4812_v49 = vld [vmem:[#allocation8 + $0x2c8] ss:$16 sps:$4 sm:$0xff]  }
 0x1cc   :  { %v1210_v4 = vadd.f32 %v1177_v36, %v1037_v1  ;;  %v1039_v5 = vpop.f32.mrb[7].mxu0  ;;  %2061 = vmatmul.mubr.bf16.vlgmr.msra.gmra.mrb[8].mxu0 %v1230_v50  ;;  %2167 = vmatmul.mubr.bf16.vlgmr.msra.gmra.mrb[8].mxu1 %v1230_v50  ;;  %v1224_v7 = vmax.f32 %v1208_v62, 0.0  ;;  %v1212_v8 = vadd.f32 %v1185_v40, %v1143_v3  ;;  %v1145_v9 = vpop.f32.mrb[7].mxu1  ;;  %v1222_v21 = vmax.f32 %v1206_v58, 0.0  ;;  %v4791_v36 = vld [vmem:[#allocation8 + $0x260] ss:$16 sps:$4 sm:$0xff]  }
 0x1cd   :  { %v1211_v14 = vadd.f32 %v1181_v37, %v1039_v5  ;;  %2082 = vmatpush1.bf16.msra.mxu0 %v4773_v55  ;;  %2188 = vmatpush1.bf16.msra.mxu1 %v4776_v56  ;;  %v1225_v19 = vmax.f32 %v1209_v2, 0.0  ;;  %v1213_v20 = vadd.f32 %v1189_v41, %v1145_v9  ;;  %v1223_v25 = vmax.f32 %v1207_v0, 0.0  ;;  %v4794_v37 = vld [vmem:[#allocation8 + $0x268] ss:$16 sps:$4 sm:$0xff]   ;;  %v4797_v40 = vld [vmem:[#allocation8 + $0x280] ss:$16 sps:$4 sm:$0xff]  }
 0x1ce   :  { %v1226_v22 = vmax.f32 %v1210_v4, 0.0  ;;  %2083 = vmatprep.subr.bf16.mxu0 %v4781_v60  ;;  %2189 = vmatprep.subr.bf16.mxu1 %v4784_v61  ;;  %v1228_v24 = vmax.f32 %v1212_v8, 0.0  ;;  %v4800_v41 = vld [vmem:[#allocation8 + $0x288] ss:$16 sps:$4 sm:$0xff]   ;;  %v4817_v50 = vld [vmem:[#allocation8 + $0x2e4] ss:$16 sps:$4 sm:$0xff]  }
 0x1cf   :  { %v1227_v26 = vmax.f32 %v1211_v14, 0.0  ;;  %v1229_v27 = vmax.f32 %v1213_v20, 0.0  ;;  %v4820_v52 = vld [vmem:[#allocation8 + $0x2ec] ss:$16 sps:$4 sm:$0xff]   ;;  %v4818_v54 = vld [vmem:[#allocation8 + $0x2e8] ss:$16 sps:$4 sm:$0xff]  }
 0x1d0   :  { %v1234_v28 = vpack.c.bf16 %v1226_v22, %v1222_v21  ;;  %v5451_v29 = vpack.c.bf16 %v1228_v24, %v1224_v7  ;;  %v4823_v55 = vld [vmem:[#allocation8 + $0x304] ss:$16 sps:$4 sm:$0xff]   ;;  %v4826_v56 = vld [vmem:[#allocation8 + $0x30c] ss:$16 sps:$4 sm:$0xff]   ;;  %v4821_v57 = vld [vmem:[#allocation8 + $0x300] ss:$16 sps:$4 sm:$0xff]  }
 0x1d1   :  { %v1235_v30 = vpack.c.bf16 %v1227_v26, %v1223_v25  ;;  %2084 = vmatpush1.bf16.msra.mxu0 %v4779_v6  ;;  %2190 = vmatpush1.bf16.msra.mxu1 %v4782_v17  ;;  %v5453_v33 = vpack.c.bf16 %v1229_v27, %v1225_v19  ;;  %v4824_v58 = vld [vmem:[#allocation8 + $0x308] ss:$16 sps:$4 sm:$0xff]   ;;  %v4829_v59 = vld [vmem:[#allocation8 + $0x324] ss:$16 sps:$4 sm:$0xff]   ;;  %v4832_v60 = vld [vmem:[#allocation8 + $0x32c] ss:$16 sps:$4 sm:$0xff]  }
 0x1d2   :  { %2085 = vmatprep.subr.bf16.mxu0 %v4787_v18  ;;  %2191 = vmatprep.subr.bf16.mxu1 %v4790_v23  ;;  %v4827_v61 = vld [vmem:[#allocation8 + $0x320] ss:$16 sps:$4 sm:$0xff]   ;;  %v4830_v62 = vld [vmem:[#allocation8 + $0x328] ss:$16 sps:$4 sm:$0xff]   ;;  %v4835_v63 = vld [vmem:[#allocation8 + $0x344] ss:$16 sps:$4 sm:$0xff]  }
 0x1d3   :  { %2070 = vmatprep.mubr.bf16.mxu0 %v1235_v30  ;;  %2176 = vmatprep.mubr.bf16.mxu1 %v1235_v30  ;;  %v4838_v0 = vld [vmem:[#allocation8 + $0x34c] ss:$16 sps:$4 sm:$0xff]   ;;  %v4833_v1 = vld [vmem:[#allocation8 + $0x340] ss:$16 sps:$4 sm:$0xff]   ;;  %v4836_v2 = vld [vmem:[#allocation8 + $0x348] ss:$16 sps:$4 sm:$0xff]  }
 0x1d4   :  { %2071 = vmatmul.mubr.bf16.gmra.mrb[12].mxu0 %v1234_v28  ;;  %2177 = vmatmul.mubr.bf16.gmra.mrb[12].mxu1 %v1234_v28  ;;  %v4841_v3 = vld [vmem:[#allocation8 + $0x364] ss:$16 sps:$4 sm:$0xff]   ;;  %v4844_v4 = vld [vmem:[#allocation8 + $0x36c] ss:$16 sps:$4 sm:$0xff]   ;;  %v4839_v5 = vld [vmem:[#allocation8 + $0x360] ss:$16 sps:$4 sm:$0xff]  }
 0x1d5   :  { %2086 = vmatpush1.bf16.msra.mxu0 %v4785_v31  ;;  %2192 = vmatpush1.bf16.msra.mxu1 %v4788_v32  ;;  %v4842_v6 = vld [vmem:[#allocation8 + $0x368] ss:$16 sps:$4 sm:$0xff]   ;;  %v4847_v7 = vld [vmem:[#allocation8 + $0x384] ss:$16 sps:$4 sm:$0xff]   ;;  %v4850_v8 = vld [vmem:[#allocation8 + $0x38c] ss:$16 sps:$4 sm:$0xff]  }
 0x1d6   :  { %2113 = vmatprep.mubr.bf16.mxu0 %v1233_v53  ;;  %2219 = vmatprep.mubr.bf16.mxu1 %v1233_v53  ;;  %v4815_v53 = vld [vmem:[#allocation8 + $0x2e0] ss:$16 sps:$4 sm:$0xff]   ;;  %v4848_v14 = vld [vmem:[#allocation8 + $0x388] ss:$16 sps:$4 sm:$0xff]   ;;  %v4853_v17 = vld [vmem:[#allocation8 + $0x3a4] ss:$16 sps:$4 sm:$0xff]  }
 0x1d7   :  { %2087 = vmatprep.subr.bf16.mxu0 %v4793_v34  ;;  %2193 = vmatprep.subr.bf16.mxu1 %v4796_v35  ;;  %v4845_v9 = vld [vmem:[#allocation8 + $0x380] ss:$16 sps:$4 sm:$0xff]   ;;  %v4856_v18 = vld [vmem:[#allocation8 + $0x3ac] ss:$16 sps:$4 sm:$0xff]   ;;  %v4854_v20 = vld [vmem:[#allocation8 + $0x3a8] ss:$16 sps:$4 sm:$0xff]  }
 0x1d8   :  { %v4851_v19 = vld [vmem:[#allocation8 + $0x3a0] ss:$16 sps:$4 sm:$0xff]   ;;  %v4859_v21 = vld [vmem:[#allocation8 + $0x3c4] ss:$16 sps:$4 sm:$0xff]   ;;  %v4862_v22 = vld [vmem:[#allocation8 + $0x3cc] ss:$16 sps:$4 sm:$0xff]  }
 0x1d9   :  { %2088 = vmatpush1.bf16.msra.mxu0 %v4791_v36  ;;  %2194 = vmatpush1.bf16.msra.mxu1 %v4794_v37  ;;  %v4857_v23 = vld [vmem:[#allocation8 + $0x3c0] ss:$16 sps:$4 sm:$0xff]   ;;  %v4860_v24 = vld [vmem:[#allocation8 + $0x3c8] ss:$16 sps:$4 sm:$0xff]   ;;  %v4865_v25 = vld [vmem:[#allocation8 + $0x3e4] ss:$16 sps:$4 sm:$0xff]  }
 0x1da   :  { %2089 = vmatprep.subr.bf16.mxu0 %v4799_v38  ;;  %2195 = vmatprep.subr.bf16.mxu1 %v4802_v39  ;;  %v4868_v26 = vld [vmem:[#allocation8 + $0x3ec] ss:$16 sps:$4 sm:$0xff]   ;;  %v4863_v27 = vld [vmem:[#allocation8 + $0x3e0] ss:$16 sps:$4 sm:$0xff]   ;;  %v4866_v28 = vld [vmem:[#allocation8 + $0x3e8] ss:$16 sps:$4 sm:$0xff]  }
 0x1db   :  { %v5097_v30 = vld [vmem:[#allocation2 + $0x4] ss:$16 sps:$4 sm:$0xff]   ;;  %v5098_v31 = vld [vmem:[#allocation2 + $0xc] ss:$16 sps:$4 sm:$0xff]   ;;  %v5099_v32 = vld [vmem:[#allocation2] ss:$16 sps:$4 sm:$0xff]  }
 0x1dc   :  { %v5100_v34 = vld [vmem:[#allocation2 + $0x8] ss:$16 sps:$4 sm:$0xff]   ;;  %v5101_v35 = vld [vmem:[#allocation2 + $0x24] ss:$16 sps:$4 sm:$0xff]   ;;  %v5102_v36 = vld [vmem:[#allocation2 + $0x2c] ss:$16 sps:$4 sm:$0xff]  }
 0x1dd   :  { %2090 = vmatpush1.bf16.msra.mxu0 %v4797_v40  ;;  %2196 = vmatpush1.bf16.msra.mxu1 %v4800_v41  ;;  %v5279_v37 = vmov 0   ;;  %v2256_v39 = vld [vmem:[%s5530_s6] sm:$0xf] }
 0x1de   :  { %2091 = vmatprep.subr.bf16.mxu0 %v4805_v42  ;;  %2197 = vmatprep.subr.bf16.mxu1 %v4808_v43 }
 0x1df   :  { %4472 = vset.pattern.permute.xlu0 %v5279_v37 }
 0x1e1   :  { %2092 = vmatpush1.bf16.msra.mxu0 %v4803_v44  ;;  %2198 = vmatpush1.bf16.msra.mxu1 %v4806_v45  ;;  %v2261_v44 = vrot.slane %v2256_v39, %v5430_v12 }
 0x1e2   :  { %2093 = vmatprep.subr.bf16.mxu0 %v4811_v46  ;;  %2199 = vmatprep.subr.bf16.mxu1 %v4814_v47 }
 0x1e5   :  { %2094 = vmatpush1.bf16.msra.mxu0 %v4809_v48  ;;  %2200 = vmatpush1.bf16.msra.mxu1 %v4812_v49  ;;  %v2265_v49 = vrot.slane %v2256_v39, %v5436_v15 }
 0x1e6   :  { %2095 = vmatprep.subr.bf16.mxu0 %v4817_v50  ;;  %2201 = vmatprep.subr.bf16.mxu1 %v4820_v52 }
 0x1e9   :  { %2096 = vmatpush1.bf16.msra.mxu0 %v4815_v53  ;;  %2202 = vmatpush1.bf16.msra.mxu1 %v4818_v54 }
 0x1ea   :  { %2097 = vmatprep.subr.bf16.mxu0 %v4823_v55  ;;  %2203 = vmatprep.subr.bf16.mxu1 %v4826_v56 }
 0x1ed   :  { %2098 = vmatpush1.bf16.msra.mxu0 %v4821_v57  ;;  %2204 = vmatpush1.bf16.msra.mxu1 %v4824_v58 }
 0x1ee   :  { %2099 = vmatprep.subr.bf16.mxu0 %v4829_v59  ;;  %2205 = vmatprep.subr.bf16.mxu1 %v4832_v60  ;;  %v2269_v59 = vrot.slane %v2256_v39, %v5433_v13 }
 0x1f1   :  { %2100 = vmatpush1.bf16.msra.mxu0 %v4827_v61  ;;  %2206 = vmatpush1.bf16.msra.mxu1 %v4830_v62 }
 0x1f2   :  { %2101 = vmatprep.subr.bf16.mxu0 %v4835_v63  ;;  %2207 = vmatprep.subr.bf16.mxu1 %v4838_v0 }
 0x1f5   :  { %2102 = vmatpush1.bf16.msra.mxu0 %v4833_v1  ;;  %2208 = vmatpush1.bf16.msra.mxu1 %v4836_v2 }
 0x1f6   :  { %2103 = vmatprep.subr.bf16.mxu0 %v4841_v3  ;;  %2209 = vmatprep.subr.bf16.mxu1 %v4844_v4 }
 0x1f9   :  { %2104 = vmatpush1.bf16.msra.mxu0 %v4839_v5  ;;  %2210 = vmatpush1.bf16.msra.mxu1 %v4842_v6  ;;  %v2273_v6 = vrot.slane %v2256_v39, %v5439_v16 }
 0x1fa   :  { %2105 = vmatprep.subr.bf16.mxu0 %v4847_v7  ;;  %2211 = vmatprep.subr.bf16.mxu1 %v4850_v8 }
 0x1fd   :  { %2106 = vmatpush1.bf16.msra.mxu0 %v4845_v9  ;;  %2212 = vmatpush1.bf16.msra.mxu1 %v4848_v14 }
 0x1fe   :  { %2107 = vmatprep.subr.bf16.mxu0 %v4853_v17  ;;  %2213 = vmatprep.subr.bf16.mxu1 %v4856_v18 }
 0x201   :  { %2108 = vmatpush1.bf16.msra.mxu0 %v4851_v19  ;;  %2214 = vmatpush1.bf16.msra.mxu1 %v4854_v20 }
 0x202   :  { %2109 = vmatprep.subr.bf16.mxu0 %v4859_v21  ;;  %2215 = vmatprep.subr.bf16.mxu1 %v4862_v22 }
 0x205   :  { %2110 = vmatpush1.bf16.msra.mxu0 %v4857_v23  ;;  %2216 = vmatpush1.bf16.msra.mxu1 %v4860_v24 }
 0x206   :  { %2111 = vmatprep.subr.bf16.mxu0 %v4865_v25  ;;  %2217 = vmatprep.subr.bf16.mxu1 %v4868_v26 }
 0x209   :  { %2112 = vmatpush1.bf16.msra.mxu0 %v4863_v27  ;;  %2218 = vmatpush1.bf16.msra.mxu1 %v4866_v28 }
 0x20a   :  { %2388 = vmatprep.subr.bf16.mxu0 %v5097_v30  ;;  %2429 = vmatprep.subr.bf16.mxu1 %v5098_v31 }
 0x20c   :  { %2114 = vmatmul.mubr.bf16.vlgmr.msra.gmra.mrb[8].mxu0 %v5449_v51  ;;  %2220 = vmatmul.mubr.bf16.vlgmr.msra.gmra.mrb[8].mxu1 %v5449_v51  ;;  %v1366_v51 = vld [vmem:[%s5529_s5] sm:$0xf] }
 0x20d   :  { %2123 = vmatprep.mubr.bf16.mxu0 %v5453_v33  ;;  %2229 = vmatprep.mubr.bf16.mxu1 %v5453_v33  ;;  %v1371_v33 = vrot.slane %v1366_v51, %v5430_v12  ;;  %v1379_v38 = vrot.slane %v1366_v51, %v5433_v13  ;;  %v1383_v40 = vrot.slane %v1366_v51, %v5439_v16 }
 0x20e   :  { %2389 = vmatpush1.bf16.msra.mxu0 %v5099_v32  ;;  %2430 = vmatpush1.bf16.msra.mxu1 %v5100_v34 }
 0x20f   :  { %2478 = vmatprep.subr.bf16.mxu0 %v5101_v35  ;;  %2519 = vmatprep.subr.bf16.mxu1 %v5102_v36 }
 0x214   :  { %2124 = vmatmul.mubr.bf16.gmra.mrb[12].mxu0 %v5451_v29  ;;  %2230 = vmatmul.mubr.bf16.gmra.mrb[12].mxu1 %v5451_v29  ;;  %v1375_v29 = vrot.slane %v1366_v51, %v5436_v15 }
 0x215   :  { %2420 = vmatprep.mubr.bf16.mxu0 %v5279_v37  ;;  %2461 = vmatprep.mubr.bf16.mxu1 %v5279_v37 }
 0x2df   :  { %v2115_v41 = vpop.f32.mrb[8].mxu0  ;;  %v2221_v42 = vpop.f32.mrb[8].mxu1 }
 0x2e0   :  { %v4399_v43 = vadd.f32 %v2115_v41, %v1371_v33  ;;  %v4407_v45 = vadd.f32 %v2221_v42, %v1379_v38  ;;  %v2117_v46 = vpop.f32.mrb[9].mxu0  ;;  %v2223_v47 = vpop.f32.mrb[9].mxu1 }
 0x2e1   :  { %v4400_v48 = vadd.f32 %v2117_v46, %v1375_v29  ;;  %v2119_v50 = vpop.f32.mrb[10].mxu0  ;;  %v2225_v52 = vpop.f32.mrb[10].mxu1  ;;  %v4408_v54 = vadd.f32 %v2223_v47, %v1383_v40 }
 0x2e2   :  { %v2240_v53 = vmax.f32 %v4399_v43, 0.0  ;;  %v4401_v55 = vadd.f32 %v2119_v50, %v1371_v33  ;;  %v2121_v56 = vpop.f32.mrb[11].mxu0  ;;  %v2227_v57 = vpop.f32.mrb[11].mxu1  ;;  %v2242_v58 = vmax.f32 %v4407_v45, 0.0  ;;  %v4409_v0 = vadd.f32 %v2225_v52, %v1379_v38 }
 0x2e3   :  { %v2241_v60 = vmax.f32 %v4400_v48, 0.0  ;;  %v4402_v61 = vadd.f32 %v2121_v56, %v1375_v29  ;;  %v4410_v1 = vadd.f32 %v2227_v57, %v1383_v40  ;;  %v2243_v4 = vmax.f32 %v4408_v54, 0.0 }
 0x2e4   :  { %v2278_v62 = vmul.f32 %v2261_v44, %v2240_v53  ;;  %v2244_v63 = vmax.f32 %v4401_v55, 0.0  ;;  %v2280_v7 = vmul.f32 %v2269_v59, %v2242_v58  ;;  %v2246_v18 = vmax.f32 %v4409_v0, 0.0 }
 0x2e5   :  { %v2279_v2 = vmul.f32 %v2265_v49, %v2241_v60  ;;  %v2245_v3 = vmax.f32 %v4402_v61, 0.0  ;;  %v2247_v19 = vmax.f32 %v4410_v1, 0.0  ;;  %v2281_v51 = vmul.f32 %v2273_v6, %v2243_v4 }
 0x2e6   :  { %v2282_v5 = vmul.f32 %v2261_v44, %v2244_v63  ;;  %v2284_v45 = vmul.f32 %v2269_v59, %v2246_v18 }
 0x2e7   :  { %v2283_v8 = vmul.f32 %v2265_v49, %v2245_v3  ;;  %v2125_v9 = vpop.f32.mrb[12].mxu0  ;;  %v2231_v14 = vpop.f32.mrb[12].mxu1  ;;  %v2294_v17 = vadd.f32 %v2279_v2, %v2278_v62  ;;  %v2285_v55 = vmul.f32 %v2273_v6, %v2247_v19 }
 0x2e8   :  { %v4403_v20 = vadd.f32 %v2125_v9, %v1371_v33  ;;  %v4411_v21 = vadd.f32 %v2231_v14, %v1379_v38  ;;  %v2127_v22 = vpop.f32.mrb[13].mxu0  ;;  %v2233_v23 = vpop.f32.mrb[13].mxu1 }
 0x2e9   :  { %v2299_v24 = vadd.f32 %v2283_v8, %v2282_v5  ;;  %v4404_v25 = vadd.f32 %v2127_v22, %v1375_v29  ;;  %v4412_v26 = vadd.f32 %v2233_v23, %v1383_v40  ;;  %v2129_v27 = vpop.f32.mrb[14].mxu0  ;;  %v2235_v28 = vpop.f32.mrb[14].mxu1  ;;  %v2295_v30 = vadd.f32 %v2294_v17, %v2280_v7 }
 0x2ea   :  { %v2248_v31 = vmax.f32 %v4403_v20, 0.0  ;;  %v4405_v32 = vadd.f32 %v2129_v27, %v1371_v33  ;;  %v4413_v34 = vadd.f32 %v2235_v28, %v1379_v38  ;;  %v2131_v35 = vpop.f32.mrb[15].mxu0  ;;  %v2237_v36 = vpop.f32.mrb[15].mxu1  ;;  %v2250_v39 = vmax.f32 %v4411_v21, 0.0 }
 0x2eb   :  { %v2249_v41 = vmax.f32 %v4404_v25, 0.0  ;;  %v4406_v42 = vadd.f32 %v2131_v35, %v1375_v29  ;;  %v4414_v43 = vadd.f32 %v2237_v36, %v1383_v40  ;;  %v2251_v47 = vmax.f32 %v4412_v26, 0.0 }
 0x2ec   :  { %v2286_v46 = vmul.f32 %v2261_v44, %v2248_v31  ;;  %v2252_v48 = vmax.f32 %v4405_v32, 0.0  ;;  %v2254_v52 = vmax.f32 %v4413_v34, 0.0  ;;  %v2296_v54 = vadd.f32 %v2295_v30, %v2281_v51 }
 0x2ed   :  { %v2287_v50 = vmul.f32 %v2265_v49, %v2249_v41  ;;  %v2253_v53 = vmax.f32 %v4406_v42, 0.0  ;;  %v2300_v57 = vadd.f32 %v2299_v24, %v2284_v45  ;;  %v2288_v33 = vmul.f32 %v2269_v59, %v2250_v39 }
 0x2ee   :  { %v2290_v56 = vmul.f32 %v2261_v44, %v2252_v48  ;;  %v2255_v58 = vmax.f32 %v4414_v43, 0.0  ;;  %2297 = vadd.xlane.f32.xlu0 %v2296_v54  ;;  %v2292_v62 = vmul.f32 %v2269_v59, %v2254_v52  ;;  %v2289_v40 = vmul.f32 %v2273_v6, %v2251_v47  ;;  %v2316_v44 = vld [vmem:[%s5526_s2] sm:$0x3]  ;;  %v4871_v48 = vld [vmem:[#allocation10 + $0x4] ss:$16 sps:$4 sm:$0xff]  }
 0x2ef   :  { %v2291_v38 = vmul.f32 %v2265_v49, %v2253_v53  ;;  %v2304_v60 = vadd.f32 %v2287_v50, %v2286_v46  ;;  %v2301_v61 = vadd.f32 %v2300_v57, %v2285_v55  ;;  %v2315_v49 = vand.u32 127, %v1158_v10  ;;  %v4874_v50 = vld [vmem:[#allocation10 + $0xc] ss:$16 sps:$4 sm:$0xff]   ;;  %v5103_v52 = vld [vmem:[#allocation2 + $0x20] ss:$16 sps:$4 sm:$0xff]  }
 0x2f0   :  { %v2293_v0 = vmul.f32 %v2273_v6, %v2255_v58  ;;  %v5280_v32 = vmov 1966171168   ;;  %v5104_v53 = vld [vmem:[#allocation2 + $0x28] ss:$16 sps:$4 sm:$0xff]   ;;  %v4872_v55 = vld [vmem:[#allocation10 + $0x8] ss:$16 sps:$4 sm:$0xff]  }
 0x2f1   :  { %v2309_v29 = vadd.f32 %v2291_v38, %v2290_v56  ;;  %v2305_v63 = vadd.f32 %v2304_v60, %v2288_v33  ;;  %v2329_v5 = vadd.s32 4294967288, %v2315_v49  ;;  %v2327_v6 = vsub.s32 %v2315_v49, %v5427_v11  ;;  %v4869_v54 = vld [vmem:[#allocation10] ss:$16 sps:$4 sm:$0xff]   ;;  %v4877_v57 = vld [vmem:[#allocation10 + $0x24] ss:$16 sps:$4 sm:$0xff]  }
 0x2f2   :  { %2302 = vadd.xlane.f32.xlu0 %v2301_v61  ;;  %v2364_v34 = vunpack.c.l.s4 %v5280_v32  ;;  %v4880_v33 = vld [vmem:[#allocation10 + $0x2c] ss:$16 sps:$4 sm:$0xff]   ;;  %v4875_v38 = vld [vmem:[#allocation10 + $0x20] ss:$16 sps:$4 sm:$0xff]   ;;  %v4878_v58 = vld [vmem:[#allocation10 + $0x28] ss:$16 sps:$4 sm:$0xff]  }
 0x2f3   :  { %v2306_v1 = vadd.f32 %v2305_v63, %v2289_v40  ;;  %v2310_v2 = vadd.f32 %v2309_v29, %v2292_v62  ;;  %v2332_v59 = vsub.s32 %v2329_v5, %v5427_v11  ;;  %v4886_v60 = vld [vmem:[#allocation10 + $0x4c] ss:$16 sps:$4 sm:$0xff]   ;;  %v4881_v61 = vld [vmem:[#allocation10 + $0x40] ss:$16 sps:$4 sm:$0xff]   ;;  %v4884_v62 = vld [vmem:[#allocation10 + $0x48] ss:$16 sps:$4 sm:$0xff]  }
 0x2f4   :  { %v2365_v35 = vunpack.c.0.s8 %v2364_v34  ;;  %v4889_v29 = vld [vmem:[#allocation10 + $0x64] ss:$16 sps:$4 sm:$0xff]   ;;  %v4892_v40 = vld [vmem:[#allocation10 + $0x6c] ss:$16 sps:$4 sm:$0xff]   ;;  %v4887_v63 = vld [vmem:[#allocation10 + $0x60] ss:$16 sps:$4 sm:$0xff]  }
 0x2f5   :  { %2307 = vadd.xlane.f32.xlu1 %v2306_v1  ;;  %v2311_v3 = vadd.f32 %v2310_v2, %v2293_v0  ;;  %v4890_v0 = vld [vmem:[#allocation10 + $0x68] ss:$16 sps:$4 sm:$0xff]   ;;  %v4895_v1 = vld [vmem:[#allocation10 + $0x84] ss:$16 sps:$4 sm:$0xff]   ;;  %v4898_v2 = vld [vmem:[#allocation10 + $0x8c] ss:$16 sps:$4 sm:$0xff]  }
 0x2f6   :  { %v2368_v51 = vsub.s32 %v2365_v35, %v5427_v11  ;;  %v4899_v5 = vld [vmem:[#allocation10 + $0xa0] ss:$16 sps:$4 sm:$0xff]   ;;  %v4937_v32 = vld [vmem:[#allocation10 + $0x164] ss:$16 sps:$4 sm:$0xff]   ;;  %v4940_v34 = vld [vmem:[#allocation10 + $0x16c] ss:$16 sps:$4 sm:$0xff]  }
 0x2f7   :  { %v4935_v35 = vld [vmem:[#allocation10 + $0x160] ss:$16 sps:$4 sm:$0xff]  }
 0x2f9   :  { %2312 = vadd.xlane.f32.xlu1 %v2311_v3  ;;  %v4893_v3 = vld [vmem:[#allocation10 + $0x80] ss:$16 sps:$4 sm:$0xff]  }
 0x308   :  { %2318 = vperm.xlu0 %4472, %v2316_v44   ;;  %v4896_v44 = vld [vmem:[#allocation10 + $0x88] ss:$16 sps:$4 sm:$0xff]  }
 0x37b   :  { %v2298_v4 = vpop.xlane.xlu0 %2297 }
 0x37c   :  { %v2328_v17 = vrot.slane %v2298_v4, %v2327_v6  ;;  %v4904_v4 = vld [vmem:[#allocation10 + $0xac] ss:$16 sps:$4 sm:$0xff]  }
 0x37f   :  { %v2303_v7 = vpop.xlane.xlu0 %2302 }
 0x380   :  { %v2333_v9 = vrot.slane %v2303_v7, %v2332_v59  ;;  %v4907_v7 = vld [vmem:[#allocation10 + $0xc4] ss:$16 sps:$4 sm:$0xff]  }
 0x382   :  { %v2308_v8 = vpop.xlane.xlu1 %2307  ;;  %v2335_v21 = vsel %vm2334_vm0, %v2333_v9, %v2328_v17  ;;  %v4908_v9 = vld [vmem:[#allocation10 + $0xc8] ss:$16 sps:$4 sm:$0xff]   ;;  %v4916_v17 = vld [vmem:[#allocation10 + $0xec] ss:$16 sps:$4 sm:$0xff]  }
 0x383   :  { %v2339_v18 = vrot.slane %v2308_v8, %v2327_v6  ;;  %v4910_v8 = vld [vmem:[#allocation10 + $0xcc] ss:$16 sps:$4 sm:$0xff]   ;;  %v4905_v6 = vld [vmem:[#allocation10 + $0xc0] ss:$16 sps:$4 sm:$0xff]  }
 0x386   :  { %v2313_v14 = vpop.xlane.xlu1 %2312 }
 0x387   :  { %v2343_v19 = vrot.slane %v2313_v14, %v2332_v59  ;;  %v2319_v20 = vpop.permute.xlu0 %2318  ;;  %v4902_v59 = vld [vmem:[#allocation10 + $0xa8] ss:$16 sps:$4 sm:$0xff]   ;;  %v4913_v14 = vld [vmem:[#allocation10 + $0xe4] ss:$16 sps:$4 sm:$0xff]  }
 0x388   :  { %vm2320_vm2 = vcmp.lt.s32.totalorder %v2315_v49, %v2319_v20  ;;  %v4901_v49 = vld [vmem:[#allocation10 + $0xa4] ss:$16 sps:$4 sm:$0xff]  }
 0x389   :  { %v2344_v22 = vsel %vm2334_vm0, %v2343_v19, %v2339_v18  ;;  %v4911_v18 = vld [vmem:[#allocation10 + $0xe0] ss:$16 sps:$4 sm:$0xff]   ;;  %v4914_v19 = vld [vmem:[#allocation10 + $0xe8] ss:$16 sps:$4 sm:$0xff]   ;;  %v4919_v20 = vld [vmem:[#allocation10 + $0x104] ss:$16 sps:$4 sm:$0xff]  }
 0x38a   :  { %v2346_v10 = vsel %vm2345_vm1, %v2344_v22, %v2335_v21  ;;  %v4922_v21 = vld [vmem:[#allocation10 + $0x10c] ss:$16 sps:$4 sm:$0xff]   ;;  %v4917_v22 = vld [vmem:[#allocation10 + $0x100] ss:$16 sps:$4 sm:$0xff]  }
 0x38b   :  { %v2348_v23 = vsel %vm2320_vm2, %v2346_v10, -1e+30  ;;  %v4920_v10 = vld [vmem:[#allocation10 + $0x108] ss:$16 sps:$4 sm:$0xff]  }
 0x38c   :  { %v2350_v24 = vsel %vm2349_vm3, %v2348_v23, -inf }
 0x38d   :  { %2351 = vmax.xlane.f32.xlu1 %v2350_v24  ;;  %v4928_v24 = vld [vmem:[#allocation10 + $0x12c] ss:$16 sps:$4 sm:$0xff]  }
 0x41a   :  { %v2352_v25 = vpop.xlane.xlu1 %2351 }
 0x41b   :  { %v2353_v26 = vsub.f32 %v2348_v23, %v2352_v25  ;;  %v4925_v23 = vld [vmem:[#allocation10 + $0x124] ss:$16 sps:$4 sm:$0xff]   ;;  %v4923_v25 = vld [vmem:[#allocation10 + $0x120] ss:$16 sps:$4 sm:$0xff]  }
 0x41d   :  { %v2354_v27 = vmul.f32 1.442695, %v2353_v26  ;;  %v4926_v26 = vld [vmem:[#allocation10 + $0x128] ss:$16 sps:$4 sm:$0xff]  }
 0x41f   :  { %5093 = vpow2.f32 %v2354_v27  ;;  %v4931_v27 = vld [vmem:[#allocation10 + $0x144] ss:$16 sps:$4 sm:$0xff]  }
 0x429   :  { %v5094_v28 = vpop.eup %5093 }
 0x42a   :  { %v2356_v30 = vsel %vm2349_vm3, %v5094_v28, 0.0 }
 0x42b   :  { %2357 = vadd.xlane.f32.xlu1 %v2356_v30  ;;  %v4929_v30 = vld [vmem:[#allocation10 + $0x140] ss:$16 sps:$4 sm:$0xff]  }
 0x4b8   :  { %v2358_v31 = vpop.xlane.xlu1 %2357 }
 0x4b9   :  { %5095 = vrcp.f32 %v2358_v31  ;;  %v4932_v31 = vld [vmem:[#allocation10 + $0x148] ss:$16 sps:$4 sm:$0xff]  }
 0x4c3   :  { %v5096_v36 = vpop.eup %5095 }
 0x4c4   :  { %v2360_v39 = vmul.f32 %v5096_v36, %v5094_v28  ;;  %v4934_v28 = vld [vmem:[#allocation10 + $0x14c] ss:$16 sps:$4 sm:$0xff]   ;;  %v4938_v36 = vld [vmem:[#allocation10 + $0x168] ss:$16 sps:$4 sm:$0xff]  }
 0x4c6   :  { %v2361_v41 = vpack.c.bf16 %v2360_v39, %v2360_v39  ;;  %v4943_v39 = vld [vmem:[#allocation10 + $0x184] ss:$16 sps:$4 sm:$0xff]  }
 0x4c8   :  { %v2369_v42 = vrot.slane %v2361_v41, %v2368_v51  ;;  %v4944_v41 = vld [vmem:[#allocation10 + $0x188] ss:$16 sps:$4 sm:$0xff]  }
 0x4ca   :  { %v2376_v43 = vrot.slane %v2369_v42, %v2368_v51  ;;  %v4941_v51 = vld [vmem:[#allocation10 + $0x180] ss:$16 sps:$4 sm:$0xff]   ;;  %v4946_v42 = vld [vmem:[#allocation10 + $0x18c] ss:$16 sps:$4 sm:$0xff]  }
 0x4cc   :  { %v4189_v45 = vpack.i.b16 %v2376_v43, %v2376_v43  ;;  %v2378_v47 = vunpack.i.h.s16 %v2376_v43  ;;  %v4949_v43 = vld [vmem:[#allocation10 + $0x1a4] ss:$16 sps:$4 sm:$0xff]  }
 0x4ce   :  { %v2383_v46 = vrot.slane %v4189_v45, %v5430_v12  ;;  %v2470_v11 = vpack.i.b16 %v2378_v47, %v2378_v47  ;;  %v4952_v45 = vld [vmem:[#allocation10 + $0x1ac] ss:$16 sps:$4 sm:$0xff]   ;;  %v4950_v47 = vld [vmem:[#allocation10 + $0x1a8] ss:$16 sps:$4 sm:$0xff]  }
 0x4d0   :  { %4190 = vmatmul.mubr.msk.bf16.vlgmr.msra.gmra.mrb[16].mxu0 %vm2384_vm4, %v2383_v46  ;;  %4191 = vmatmul.mubr.msk.bf16.vlgmr.msra.gmra.mrb[16].mxu1 %vm2384_vm4, %v2383_v46  ;;  %v2474_v56 = vrot.slane %v2470_v11, %v5430_v12  ;;  %v4947_v46 = vld [vmem:[#allocation10 + $0x1a0] ss:$16 sps:$4 sm:$0xff]  }
 0x4d1   :  { %2479 = vmatpush1.bf16.msra.mxu0 %v5103_v52  ;;  %2520 = vmatpush1.bf16.msra.mxu1 %v5104_v53  ;;  %v4953_v52 = vld [vmem:[#allocation10 + $0x1c0] ss:$16 sps:$4 sm:$0xff]   ;;  %v4956_v53 = vld [vmem:[#allocation10 + $0x1c8] ss:$16 sps:$4 sm:$0xff]  }
 0x4d2   :  { %2510 = vmatprep.mubr.bf16.mxu0 %v5279_v37  ;;  %2551 = vmatprep.mubr.bf16.mxu1 %v5279_v37  ;;  %v4883_v37 = vld [vmem:[#allocation10 + $0x44] ss:$16 sps:$4 sm:$0xff]   ;;  %v4959_v11 = vld [vmem:[#allocation10 + $0x1e0] ss:$16 sps:$4 sm:$0xff]  }
 0x4d3   :  { %3390 = vmatprep.subr.bf16.mxu0 %v4871_v48  ;;  %3472 = vmatprep.subr.bf16.mxu1 %v4874_v50  ;;  %v4955_v48 = vld [vmem:[#allocation10 + $0x1c4] ss:$16 sps:$4 sm:$0xff]   ;;  %v4958_v50 = vld [vmem:[#allocation10 + $0x1cc] ss:$16 sps:$4 sm:$0xff]  }
 0x4d8   :  { %4192 = vmatmul.mubr.msk.bf16.vlgmr.msra.gmra.mrb[20].mxu0 %vm2384_vm4, %v2474_v56  ;;  %4193 = vmatmul.mubr.msk.bf16.vlgmr.msra.gmra.mrb[20].mxu1 %vm2384_vm4, %v2474_v56  ;;  %v4964_v56 = vld [vmem:[#allocation10 + $0x1ec] ss:$16 sps:$4 sm:$0xff]  }
 0x4d9   :  { %3391 = vmatpush1.bf16.msra.mxu0 %v4869_v54  ;;  %3473 = vmatpush1.bf16.msra.mxu1 %v4872_v55  ;;  %v4961_v54 = vld [vmem:[#allocation10 + $0x1e4] ss:$16 sps:$4 sm:$0xff]   ;;  %v4962_v55 = vld [vmem:[#allocation10 + $0x1e8] ss:$16 sps:$4 sm:$0xff]  }
 0x4da   :  { %3392 = vmatprep.subr.bf16.mxu0 %v4877_v57  ;;  %3474 = vmatprep.subr.bf16.mxu1 %v4880_v33  ;;  %v4967_v57 = vld [vmem:[#allocation10 + $0x204] ss:$16 sps:$4 sm:$0xff]   ;;  %v4970_v33 = vld [vmem:[#allocation10 + $0x20c] ss:$16 sps:$4 sm:$0xff]  }
 0x4dd   :  { %3393 = vmatpush1.bf16.msra.mxu0 %v4875_v38  ;;  %3475 = vmatpush1.bf16.msra.mxu1 %v4878_v58 }
 0x4de   :  { %3394 = vmatprep.subr.bf16.mxu0 %v4883_v37  ;;  %3476 = vmatprep.subr.bf16.mxu1 %v4886_v60 }
 0x4e1   :  { %3395 = vmatpush1.bf16.msra.mxu0 %v4881_v61  ;;  %3477 = vmatpush1.bf16.msra.mxu1 %v4884_v62 }
 0x4e2   :  { %3396 = vmatprep.subr.bf16.mxu0 %v4889_v29  ;;  %3478 = vmatprep.subr.bf16.mxu1 %v4892_v40 }
 0x4e5   :  { %3397 = vmatpush1.bf16.msra.mxu0 %v4887_v63  ;;  %3479 = vmatpush1.bf16.msra.mxu1 %v4890_v0 }
 0x4e6   :  { %3398 = vmatprep.subr.bf16.mxu0 %v4895_v1  ;;  %3480 = vmatprep.subr.bf16.mxu1 %v4898_v2 }
 0x4e9   :  { %3399 = vmatpush1.bf16.msra.mxu0 %v4893_v3  ;;  %3481 = vmatpush1.bf16.msra.mxu1 %v4896_v44 }
 0x4ea   :  { %3400 = vmatprep.subr.bf16.mxu0 %v4901_v49  ;;  %3482 = vmatprep.subr.bf16.mxu1 %v4904_v4 }
 0x4ed   :  { %3401 = vmatpush1.bf16.msra.mxu0 %v4899_v5  ;;  %3483 = vmatpush1.bf16.msra.mxu1 %v4902_v59 }
 0x4ee   :  { %3402 = vmatprep.subr.bf16.mxu0 %v4907_v7  ;;  %3484 = vmatprep.subr.bf16.mxu1 %v4910_v8 }
 0x4f1   :  { %3403 = vmatpush1.bf16.msra.mxu0 %v4905_v6  ;;  %3485 = vmatpush1.bf16.msra.mxu1 %v4908_v9 }
 0x4f2   :  { %3404 = vmatprep.subr.bf16.mxu0 %v4913_v14  ;;  %3486 = vmatprep.subr.bf16.mxu1 %v4916_v17 }
 0x4f5   :  { %3405 = vmatpush1.bf16.msra.mxu0 %v4911_v18  ;;  %3487 = vmatpush1.bf16.msra.mxu1 %v4914_v19 }
 0x4f6   :  { %3406 = vmatprep.subr.bf16.mxu0 %v4919_v20  ;;  %3488 = vmatprep.subr.bf16.mxu1 %v4922_v21 }
 0x4f9   :  { %3407 = vmatpush1.bf16.msra.mxu0 %v4917_v22  ;;  %3489 = vmatpush1.bf16.msra.mxu1 %v4920_v10 }
 0x4fa   :  { %3408 = vmatprep.subr.bf16.mxu0 %v4925_v23  ;;  %3490 = vmatprep.subr.bf16.mxu1 %v4928_v24 }
 0x4fd   :  { %3409 = vmatpush1.bf16.msra.mxu0 %v4923_v25  ;;  %3491 = vmatpush1.bf16.msra.mxu1 %v4926_v26 }
 0x4fe   :  { %3410 = vmatprep.subr.bf16.mxu0 %v4931_v27  ;;  %3492 = vmatprep.subr.bf16.mxu1 %v4934_v28 }
 0x501   :  { %3411 = vmatpush1.bf16.msra.mxu0 %v4929_v30  ;;  %3493 = vmatpush1.bf16.msra.mxu1 %v4932_v31 }
 0x502   :  { %3412 = vmatprep.subr.bf16.mxu0 %v4937_v32  ;;  %3494 = vmatprep.subr.bf16.mxu1 %v4940_v34 }
 0x505   :  { %3413 = vmatpush1.bf16.msra.mxu0 %v4935_v35  ;;  %3495 = vmatpush1.bf16.msra.mxu1 %v4938_v36  ;;  %v4965_v36 = vld [vmem:[#allocation10 + $0x200] ss:$16 sps:$4 sm:$0xff]  }
 0x506   :  { %3414 = vmatprep.subr.bf16.mxu0 %v4943_v39  ;;  %3496 = vmatprep.subr.bf16.mxu1 %v4946_v42  ;;  %v4976_v42 = vld [vmem:[#allocation10 + $0x22c] ss:$16 sps:$4 sm:$0xff]  }
 0x509   :  { %3415 = vmatpush1.bf16.msra.mxu0 %v4941_v51  ;;  %3497 = vmatpush1.bf16.msra.mxu1 %v4944_v41  ;;  %v4968_v51 = vld [vmem:[#allocation10 + $0x208] ss:$16 sps:$4 sm:$0xff]   ;;  %v4973_v41 = vld [vmem:[#allocation10 + $0x224] ss:$16 sps:$4 sm:$0xff]  }
 0x50a   :  { %3416 = vmatprep.subr.bf16.mxu0 %v4949_v43  ;;  %3498 = vmatprep.subr.bf16.mxu1 %v4952_v45  ;;  %v4971_v45 = vld [vmem:[#allocation10 + $0x220] ss:$16 sps:$4 sm:$0xff]  }
 0x50d   :  { %3417 = vmatpush1.bf16.msra.mxu0 %v4947_v46  ;;  %3499 = vmatpush1.bf16.msra.mxu1 %v4950_v47  ;;  %v4974_v46 = vld [vmem:[#allocation10 + $0x228] ss:$16 sps:$4 sm:$0xff]   ;;  %v4979_v47 = vld [vmem:[#allocation10 + $0x244] ss:$16 sps:$4 sm:$0xff]  }
 0x50e   :  { %3418 = vmatprep.subr.bf16.mxu0 %v4955_v48  ;;  %3500 = vmatprep.subr.bf16.mxu1 %v4958_v50  ;;  %v4982_v48 = vld [vmem:[#allocation10 + $0x24c] ss:$16 sps:$4 sm:$0xff]   ;;  %v4977_v50 = vld [vmem:[#allocation10 + $0x240] ss:$16 sps:$4 sm:$0xff]  }
 0x511   :  { %3419 = vmatpush1.bf16.msra.mxu0 %v4953_v52  ;;  %3501 = vmatpush1.bf16.msra.mxu1 %v4956_v53  ;;  %v4980_v52 = vld [vmem:[#allocation10 + $0x248] ss:$16 sps:$4 sm:$0xff]   ;;  %v4985_v53 = vld [vmem:[#allocation10 + $0x264] ss:$16 sps:$4 sm:$0xff]  }
 0x512   :  { %3420 = vmatprep.subr.bf16.mxu0 %v4961_v54  ;;  %3502 = vmatprep.subr.bf16.mxu1 %v4964_v56  ;;  %v4983_v54 = vld [vmem:[#allocation10 + $0x260] ss:$16 sps:$4 sm:$0xff]   ;;  %v4991_v56 = vld [vmem:[#allocation10 + $0x284] ss:$16 sps:$4 sm:$0xff]  }
 0x515   :  { %3421 = vmatpush1.bf16.msra.mxu0 %v4959_v11  ;;  %3503 = vmatpush1.bf16.msra.mxu1 %v4962_v55  ;;  %v4988_v11 = vld [vmem:[#allocation10 + $0x26c] ss:$16 sps:$4 sm:$0xff]   ;;  %v4986_v55 = vld [vmem:[#allocation10 + $0x268] ss:$16 sps:$4 sm:$0xff]  }
 0x516   :  { %3431 = vmatprep.subr.bf16.mxu0 %v4967_v57  ;;  %3513 = vmatprep.subr.bf16.mxu1 %v4970_v33  ;;  %v4994_v57 = vld [vmem:[#allocation10 + $0x28c] ss:$16 sps:$4 sm:$0xff]   ;;  %v4989_v33 = vld [vmem:[#allocation10 + $0x280] ss:$16 sps:$4 sm:$0xff]  }
 0x5a3   :  { %v2422_v38 = vpop.f32.mrb[16].mxu0  ;;  %v2463_v58 = vpop.f32.mrb[16].mxu1 }
 0x5a4   :  { %v2424_v37 = vpop.f32.mrb[17].mxu0  ;;  %v2465_v60 = vpop.f32.mrb[17].mxu1  ;;  %v2560_v1 = vpack.c.bf16 %v2422_v38, %v2422_v38  ;;  %v2562_v2 = vpack.c.bf16 %v2463_v58, %v2463_v58  ;;  %v4992_v38 = vld [vmem:[#allocation10 + $0x288] ss:$16 sps:$4 sm:$0xff]   ;;  %v4997_v58 = vld [vmem:[#allocation10 + $0x2a4] ss:$16 sps:$4 sm:$0xff]  }
 0x5a5   :  { %v2426_v61 = vpop.f32.mrb[18].mxu0  ;;  %v2467_v62 = vpop.f32.mrb[18].mxu1  ;;  %v2561_v5 = vpack.c.bf16 %v2424_v37, %v2424_v37  ;;  %v2563_v59 = vpack.c.bf16 %v2465_v60, %v2465_v60  ;;  %v5000_v37 = vld [vmem:[#allocation10 + $0x2ac] ss:$16 sps:$4 sm:$0xff]   ;;  %v4995_v60 = vld [vmem:[#allocation10 + $0x2a0] ss:$16 sps:$4 sm:$0xff]  }
 0x5a6   :  { %v2427_v29 = vpop.f32.mrb[19].mxu0  ;;  %v2468_v40 = vpop.f32.mrb[19].mxu1  ;;  %v2726_v22 = vunpack.c.l.b16 %v2560_v1  ;;  %v2728_v10 = vunpack.c.l.b16 %v2562_v2  ;;  %v4998_v61 = vld [vmem:[#allocation10 + $0x2a8] ss:$16 sps:$4 sm:$0xff]   ;;  %v5003_v62 = vld [vmem:[#allocation10 + $0x2c4] ss:$16 sps:$4 sm:$0xff]  }
 0x5a7   :  { %v2727_v25 = vunpack.c.l.b16 %v2561_v5  ;;  %v2729_v26 = vunpack.c.l.b16 %v2563_v59  ;;  %v5006_v29 = vld [vmem:[#allocation10 + $0x2cc] ss:$16 sps:$4 sm:$0xff]   ;;  %v5001_v40 = vld [vmem:[#allocation10 + $0x2c0] ss:$16 sps:$4 sm:$0xff]   ;;  %v5016_v5 = vld [vmem:[#allocation10 + $0x308] ss:$16 sps:$4 sm:$0xff]  }
 0x5a8   :  { %v5012_v1 = vld [vmem:[#allocation10 + $0x2ec] ss:$16 sps:$4 sm:$0xff]   ;;  %v5007_v2 = vld [vmem:[#allocation10 + $0x2e0] ss:$16 sps:$4 sm:$0xff]   ;;  %v5021_v59 = vld [vmem:[#allocation10 + $0x324] ss:$16 sps:$4 sm:$0xff]  }
 0x5ab   :  { %v2512_v63 = vpop.f32.mrb[20].mxu0  ;;  %v2553_v0 = vpop.f32.mrb[20].mxu1 }
 0x5ac   :  { %v2564_v3 = vpack.c.bf16 %v2512_v63, %v2512_v63  ;;  %v2566_v44 = vpack.c.bf16 %v2553_v0, %v2553_v0  ;;  %v2514_v49 = vpop.f32.mrb[21].mxu0  ;;  %v2555_v4 = vpop.f32.mrb[21].mxu1  ;;  %v5004_v63 = vld [vmem:[#allocation10 + $0x2c8] ss:$16 sps:$4 sm:$0xff]   ;;  %v5009_v0 = vld [vmem:[#allocation10 + $0x2e4] ss:$16 sps:$4 sm:$0xff]  }
 0x5ad   :  { %v2565_v7 = vpack.c.bf16 %v2514_v49, %v2514_v49  ;;  %v2567_v8 = vpack.c.bf16 %v2555_v4, %v2555_v4  ;;  %v2516_v6 = vpop.f32.mrb[22].mxu0  ;;  %v2557_v9 = vpop.f32.mrb[22].mxu1  ;;  %v5018_v49 = vld [vmem:[#allocation10 + $0x30c] ss:$16 sps:$4 sm:$0xff]   ;;  %v5013_v4 = vld [vmem:[#allocation10 + $0x300] ss:$16 sps:$4 sm:$0xff]  }
 0x5ae   :  { %v2730_v14 = vunpack.c.l.b16 %v2564_v3  ;;  %v2732_v17 = vunpack.c.l.b16 %v2566_v44  ;;  %v2517_v18 = vpop.f32.mrb[23].mxu0  ;;  %v2558_v19 = vpop.f32.mrb[23].mxu1  ;;  %v5010_v3 = vld [vmem:[#allocation10 + $0x2e8] ss:$16 sps:$4 sm:$0xff]   ;;  %v5015_v44 = vld [vmem:[#allocation10 + $0x304] ss:$16 sps:$4 sm:$0xff]  }
 0x5af   :  { %v2731_v20 = vunpack.c.l.b16 %v2565_v7  ;;  %v2733_v21 = vunpack.c.l.b16 %v2567_v8  ;;  %v5024_v7 = vld [vmem:[#allocation10 + $0x32c] ss:$16 sps:$4 sm:$0xff]   ;;  %v5019_v8 = vld [vmem:[#allocation10 + $0x320] ss:$16 sps:$4 sm:$0xff]   ;;  %v5022_v6 = vld [vmem:[#allocation10 + $0x328] ss:$16 sps:$4 sm:$0xff]  }
 0x5b0   :  { %v2734_v23 = vrot.slane %v2730_v14, 7  ;;  %v2738_v24 = vrot.slane %v2732_v17, 7  ;;  %v5027_v9 = vld [vmem:[#allocation10 + $0x344] ss:$16 sps:$4 sm:$0xff]   ;;  %v5030_v14 = vld [vmem:[#allocation10 + $0x34c] ss:$16 sps:$4 sm:$0xff]  }
 0x5b1   :  { %v2736_v27 = vrot.slane %v2731_v20, 7  ;;  %v2740_v28 = vrot.slane %v2733_v21, 7  ;;  %v5025_v17 = vld [vmem:[#allocation10 + $0x340] ss:$16 sps:$4 sm:$0xff]   ;;  %v5028_v18 = vld [vmem:[#allocation10 + $0x348] ss:$16 sps:$4 sm:$0xff]  }
 0x5b2   :  { %v2735_v30 = vsel %vm2345_vm1, %v2734_v23, %v2726_v22  ;;  %v5496_v31 = vsel %vm2345_vm1, %v2738_v24, %v2728_v10  ;;  %v5033_v19 = vld [vmem:[#allocation10 + $0x364] ss:$16 sps:$4 sm:$0xff]   ;;  %v5036_v20 = vld [vmem:[#allocation10 + $0x36c] ss:$16 sps:$4 sm:$0xff]   ;;  %v5031_v21 = vld [vmem:[#allocation10 + $0x360] ss:$16 sps:$4 sm:$0xff]  }
 0x5b3   :  { %v2737_v32 = vsel %vm2345_vm1, %v2736_v27, %v2727_v25  ;;  %v2741_v34 = vsel %vm2345_vm1, %v2740_v28, %v2729_v26  ;;  %v2742_v39 = vpack.c.b16 %v2735_v30, %v2735_v30  ;;  %v5034_v22 = vld [vmem:[#allocation10 + $0x368] ss:$16 sps:$4 sm:$0xff]   ;;  %v5039_v10 = vld [vmem:[#allocation10 + $0x384] ss:$16 sps:$4 sm:$0xff]   ;;  %v5042_v23 = vld [vmem:[#allocation10 + $0x38c] ss:$16 sps:$4 sm:$0xff]  }
 0x5b4   :  { %v2743_v35 = vpack.c.b16 %v2737_v32, %v2737_v32  ;;  %v2745_v43 = vpack.c.b16 %v2741_v34, %v2741_v34  ;;  %v5037_v24 = vld [vmem:[#allocation10 + $0x380] ss:$16 sps:$4 sm:$0xff]   ;;  %v5040_v25 = vld [vmem:[#allocation10 + $0x388] ss:$16 sps:$4 sm:$0xff]   ;;  %v5045_v26 = vld [vmem:[#allocation10 + $0x3a4] ss:$16 sps:$4 sm:$0xff]  }
 0x5b5   :  { %v5048_v27 = vld [vmem:[#allocation10 + $0x3ac] ss:$16 sps:$4 sm:$0xff]   ;;  %v5043_v28 = vld [vmem:[#allocation10 + $0x3a0] ss:$16 sps:$4 sm:$0xff]   ;;  %v5046_v30 = vld [vmem:[#allocation10 + $0x3a8] ss:$16 sps:$4 sm:$0xff]  }
 0x5b6   :  { %3422 = vmatprep.mubr.bf16.mxu0 %v2743_v35  ;;  %3504 = vmatprep.mubr.bf16.mxu1 %v2743_v35  ;;  %v5051_v32 = vld [vmem:[#allocation10 + $0x3c4] ss:$16 sps:$4 sm:$0xff]   ;;  %v5054_v34 = vld [vmem:[#allocation10 + $0x3cc] ss:$16 sps:$4 sm:$0xff]   ;;  %v5049_v35 = vld [vmem:[#allocation10 + $0x3c0] ss:$16 sps:$4 sm:$0xff]  }
 0x5b7   :  { %3423 = vmatmul.mubr.bf16.vlgmr.msra.gmra.mrb[24].mxu0 %v2742_v39  ;;  %3505 = vmatmul.mubr.bf16.vlgmr.msra.gmra.mrb[24].mxu1 %v2742_v39  ;;  %v5060_v39 = vld [vmem:[#allocation10 + $0x3ec] ss:$16 sps:$4 sm:$0xff]  }
 0x5b8   :  { %3432 = vmatpush1.bf16.msra.mxu0 %v4965_v36  ;;  %3514 = vmatpush1.bf16.msra.mxu1 %v4968_v51  ;;  %v5052_v36 = vld [vmem:[#allocation10 + $0x3c8] ss:$16 sps:$4 sm:$0xff]   ;;  %v5057_v51 = vld [vmem:[#allocation10 + $0x3e4] ss:$16 sps:$4 sm:$0xff]  }
 0x5b9   :  { %3463 = vmatprep.mubr.bf16.mxu0 %v2745_v43  ;;  %3545 = vmatprep.mubr.bf16.mxu1 %v2745_v43  ;;  %v5061_v43 = vld [vmem:[#allocation11 + $0x40] sm:$0xff]  }
 0x5ba   :  { %3433 = vmatprep.subr.bf16.mxu0 %v4973_v41  ;;  %3515 = vmatprep.subr.bf16.mxu1 %v4976_v42  ;;  %v5055_v41 = vld [vmem:[#allocation10 + $0x3e0] ss:$16 sps:$4 sm:$0xff]   ;;  %v5058_v42 = vld [vmem:[#allocation10 + $0x3e8] ss:$16 sps:$4 sm:$0xff]  }
 0x5bc   :  { %3434 = vmatpush1.bf16.msra.mxu0 %v4971_v45  ;;  %3516 = vmatpush1.bf16.msra.mxu1 %v4974_v46  ;;  %v5062_v45 = vld [vmem:[#allocation11 + $0xc0] sm:$0xff]  }
 0x5bd   :  { %3435 = vmatprep.subr.bf16.mxu0 %v4979_v47  ;;  %3517 = vmatprep.subr.bf16.mxu1 %v4982_v48  ;;  %v5063_v46 = vld [vmem:[#allocation11] sm:$0xff]   ;;  %v2744_v48 = vpack.c.b16 %v5496_v31, %v5496_v31  ;;  %v5073_v31 = vld [vmem:[#allocation11 + $0x58] sm:$0xff]  }
 0x5be   :  { %v5064_v47 = vld [vmem:[#allocation11 + $0x80] sm:$0xff]  }
 0x5c0   :  { %3436 = vmatpush1.bf16.msra.mxu0 %v4977_v50  ;;  %3518 = vmatpush1.bf16.msra.mxu1 %v4980_v52  ;;  %v5065_v50 = vld [vmem:[#allocation11 + $0x48] sm:$0xff]  }
 0x5c1   :  { %3437 = vmatprep.subr.bf16.mxu0 %v4985_v53  ;;  %3519 = vmatprep.subr.bf16.mxu1 %v4988_v11  ;;  %v5066_v52 = vld [vmem:[#allocation11 + $0xc8] sm:$0xff]  }
 0x5c2   :  { %v5067_v53 = vld [vmem:[#allocation11 + $0x8] sm:$0xff]  }
 0x5c3   :  { %v5068_v11 = vld [vmem:[#allocation11 + $0x88] sm:$0xff]  }
 0x5c4   :  { %3438 = vmatpush1.bf16.msra.mxu0 %v4983_v54  ;;  %3520 = vmatpush1.bf16.msra.mxu1 %v4986_v55  ;;  %v5069_v54 = vld [vmem:[#allocation11 + $0x50] sm:$0xff]  }
 0x5c5   :  { %3439 = vmatprep.subr.bf16.mxu0 %v4991_v56  ;;  %3521 = vmatprep.subr.bf16.mxu1 %v4994_v57  ;;  %v5070_v55 = vld [vmem:[#allocation11 + $0xd0] sm:$0xff]  }
 0x5c6   :  { %v5071_v56 = vld [vmem:[#allocation11 + $0x10] sm:$0xff]  }
 0x5c7   :  { %v5072_v57 = vld [vmem:[#allocation11 + $0x90] sm:$0xff]  }
 0x5c8   :  { %3440 = vmatpush1.bf16.msra.mxu0 %v4989_v33  ;;  %3522 = vmatpush1.bf16.msra.mxu1 %v4992_v38  ;;  %v5074_v33 = vld [vmem:[#allocation11 + $0xd8] sm:$0xff]  }
 0x5c9   :  { %3441 = vmatprep.subr.bf16.mxu0 %v4997_v58  ;;  %3523 = vmatprep.subr.bf16.mxu1 %v5000_v37  ;;  %v5075_v38 = vld [vmem:[#allocation11 + $0x18] sm:$0xff]   ;;  %v5077_v37 = vld [vmem:[#allocation11 + $0x60] sm:$0xff]  }
 0x5ca   :  { %v5076_v58 = vld [vmem:[#allocation11 + $0x98] sm:$0xff]  }
 0x5cc   :  { %3442 = vmatpush1.bf16.msra.mxu0 %v4995_v60  ;;  %3524 = vmatpush1.bf16.msra.mxu1 %v4998_v61  ;;  %v5078_v60 = vld [vmem:[#allocation11 + $0xe0] sm:$0xff]  }
 0x5cd   :  { %3443 = vmatprep.subr.bf16.mxu0 %v5003_v62  ;;  %3525 = vmatprep.subr.bf16.mxu1 %v5006_v29  ;;  %v5079_v61 = vld [vmem:[#allocation11 + $0x20] sm:$0xff]   ;;  %v5081_v29 = vld [vmem:[#allocation11 + $0x68] sm:$0xff]  }
 0x5ce   :  { %v5080_v62 = vld [vmem:[#allocation11 + $0xa0] sm:$0xff]  }
 0x5d0   :  { %3444 = vmatpush1.bf16.msra.mxu0 %v5001_v40  ;;  %3526 = vmatpush1.bf16.msra.mxu1 %v5004_v63  ;;  %v5082_v40 = vld [vmem:[#allocation11 + $0xe8] sm:$0xff]  }
 0x5d1   :  { %3445 = vmatprep.subr.bf16.mxu0 %v5009_v0  ;;  %3527 = vmatprep.subr.bf16.mxu1 %v5012_v1  ;;  %v5083_v63 = vld [vmem:[#allocation11 + $0x28] sm:$0xff]   ;;  %v5085_v1 = vld [vmem:[#allocation11 + $0x70] sm:$0xff]  }
 0x5d2   :  { %v5084_v0 = vld [vmem:[#allocation11 + $0xa8] sm:$0xff]  }
 0x5d4   :  { %3446 = vmatpush1.bf16.msra.mxu0 %v5007_v2  ;;  %3528 = vmatpush1.bf16.msra.mxu1 %v5010_v3  ;;  %v5086_v2 = vld [vmem:[#allocation11 + $0xf0] sm:$0xff]  }
 0x5d5   :  { %3447 = vmatprep.subr.bf16.mxu0 %v5015_v44  ;;  %3529 = vmatprep.subr.bf16.mxu1 %v5018_v49  ;;  %v5087_v3 = vld [vmem:[#allocation11 + $0x30] sm:$0xff]   ;;  %v5089_v49 = vld [vmem:[#allocation11 + $0x78] sm:$0xff]  }
 0x5d6   :  { %v5088_v44 = vld [vmem:[#allocation11 + $0xb0] sm:$0xff]  }
 0x5d8   :  { %3448 = vmatpush1.bf16.msra.mxu0 %v5013_v4  ;;  %3530 = vmatpush1.bf16.msra.mxu1 %v5016_v5  ;;  %v5090_v4 = vld [vmem:[#allocation11 + $0xf8] sm:$0xff]  }
 0x5d9   :  { %3449 = vmatprep.subr.bf16.mxu0 %v5021_v59  ;;  %3531 = vmatprep.subr.bf16.mxu1 %v5024_v7  ;;  %v5091_v5 = vld [vmem:[#allocation11 + $0x38] sm:$0xff]  }
 0x5da   :  { %v5092_v59 = vld [vmem:[#allocation11 + $0xb8] sm:$0xff]  }
 0x5db   :  { %v2696_v7 = vld [vmem:[%s5532_s8] sm:$0xf] }
 0x5dc   :  { %3450 = vmatpush1.bf16.msra.mxu0 %v5019_v8  ;;  %3532 = vmatpush1.bf16.msra.mxu1 %v5022_v6  ;;  %v2701_v8 = vrot.slane %v2696_v7, %v5430_v12  ;;  %v2709_v6 = vrot.slane %v2696_v7, %v5433_v13 }
 0x5dd   :  { %3451 = vmatprep.subr.bf16.mxu0 %v5027_v9  ;;  %3533 = vmatprep.subr.bf16.mxu1 %v5030_v14  ;;  %v2705_v9 = vrot.slane %v2696_v7, %v5436_v15  ;;  %v2713_v14 = vrot.slane %v2696_v7, %v5439_v16 }
 0x5e0   :  { %3452 = vmatpush1.bf16.msra.mxu0 %v5025_v17  ;;  %3534 = vmatpush1.bf16.msra.mxu1 %v5028_v18 }
 0x5e1   :  { %3453 = vmatprep.subr.bf16.mxu0 %v5033_v19  ;;  %3535 = vmatprep.subr.bf16.mxu1 %v5036_v20 }
 0x5e4   :  { %3454 = vmatpush1.bf16.msra.mxu0 %v5031_v21  ;;  %3536 = vmatpush1.bf16.msra.mxu1 %v5034_v22 }
 0x5e5   :  { %3455 = vmatprep.subr.bf16.mxu0 %v5039_v10  ;;  %3537 = vmatprep.subr.bf16.mxu1 %v5042_v23 }
 0x5e8   :  { %3456 = vmatpush1.bf16.msra.mxu0 %v5037_v24  ;;  %3538 = vmatpush1.bf16.msra.mxu1 %v5040_v25 }
 0x5e9   :  { %3457 = vmatprep.subr.bf16.mxu0 %v5045_v26  ;;  %3539 = vmatprep.subr.bf16.mxu1 %v5048_v27 }
 0x5ec   :  { %3458 = vmatpush1.bf16.msra.mxu0 %v5043_v28  ;;  %3540 = vmatpush1.bf16.msra.mxu1 %v5046_v30 }
 0x5ed   :  { %3459 = vmatprep.subr.bf16.mxu0 %v5051_v32  ;;  %3541 = vmatprep.subr.bf16.mxu1 %v5054_v34 }
 0x5f0   :  { %3460 = vmatpush1.bf16.msra.mxu0 %v5049_v35  ;;  %3542 = vmatpush1.bf16.msra.mxu1 %v5052_v36 }
 0x5f1   :  { %3461 = vmatprep.subr.bf16.mxu0 %v5057_v51  ;;  %3543 = vmatprep.subr.bf16.mxu1 %v5060_v39  ;;  %v4322_v51 = vld [vmem:[%s5534_s10] ss:$0 sm:$0xff] }
 0x5f4   :  { %3462 = vmatpush1.bf16.msra.mxu0 %v5055_v41  ;;  %3544 = vmatpush1.bf16.msra.mxu1 %v5058_v42 }
 0x5f5   :  { %4355 = vmatprep.subr.bf16.mxu0 %v5061_v43  ;;  %4377 = vmatprep.subr.bf16.mxu1 %v5062_v45 }
 0x5f7   :  { %3464 = vmatmul.mubr.bf16.vlgmr.msra.gmra.mrb[24].mxu0 %v2744_v48  ;;  %3546 = vmatmul.mubr.bf16.vlgmr.msra.gmra.mrb[24].mxu1 %v2744_v48 }
 0x5f8   :  { %4356 = vmatpush3.bf16.msra.mxu0 %v5063_v46  ;;  %4378 = vmatpush3.bf16.msra.mxu1 %v5064_v47 }
 0x5f9   :  { %4357 = vmatprep.subr.bf16.mxu0 %v5065_v50  ;;  %4379 = vmatprep.subr.bf16.mxu1 %v5066_v52 }
 0x5fc   :  { %4358 = vmatpush3.bf16.msra.mxu0 %v5067_v53  ;;  %4380 = vmatpush3.bf16.msra.mxu1 %v5068_v11 }
 0x5fd   :  { %4359 = vmatprep.subr.bf16.mxu0 %v5069_v54  ;;  %4381 = vmatprep.subr.bf16.mxu1 %v5070_v55 }
 0x600   :  { %4360 = vmatpush3.bf16.msra.mxu0 %v5071_v56  ;;  %4382 = vmatpush3.bf16.msra.mxu1 %v5072_v57 }
 0x601   :  { %4361 = vmatprep.subr.bf16.mxu0 %v5073_v31  ;;  %4383 = vmatprep.subr.bf16.mxu1 %v5074_v33 }
 0x604   :  { %4362 = vmatpush3.bf16.msra.mxu0 %v5075_v38  ;;  %4384 = vmatpush3.bf16.msra.mxu1 %v5076_v58 }
 0x605   :  { %4363 = vmatprep.subr.bf16.mxu0 %v5077_v37  ;;  %4385 = vmatprep.subr.bf16.mxu1 %v5078_v60 }
 0x608   :  { %4364 = vmatpush3.bf16.msra.mxu0 %v5079_v61  ;;  %4386 = vmatpush3.bf16.msra.mxu1 %v5080_v62 }
 0x609   :  { %4365 = vmatprep.subr.bf16.mxu0 %v5081_v29  ;;  %4387 = vmatprep.subr.bf16.mxu1 %v5082_v40 }
 0x60c   :  { %4366 = vmatpush3.bf16.msra.mxu0 %v5083_v63  ;;  %4388 = vmatpush3.bf16.msra.mxu1 %v5084_v0 }
 0x60d   :  { %4367 = vmatprep.subr.bf16.mxu0 %v5085_v1  ;;  %4389 = vmatprep.subr.bf16.mxu1 %v5086_v2 }
 0x610   :  { %4368 = vmatpush3.bf16.msra.mxu0 %v5087_v3  ;;  %4390 = vmatpush3.bf16.msra.mxu1 %v5088_v44 }
 0x611   :  { %4369 = vmatprep.subr.bf16.mxu0 %v5089_v49  ;;  %4391 = vmatprep.subr.bf16.mxu1 %v5090_v4 }
 0x614   :  { %4370 = vmatpush3.bf16.msra.mxu0 %v5091_v5  ;;  %4392 = vmatpush3.bf16.msra.mxu1 %v5092_v59 }
 0x6ca   :  { %v3465_v17 = vpop.f32.mrb[24].mxu0  ;;  %v3547_v18 = vpop.f32.mrb[24].mxu1 }
 0x6cb   :  { %v4415_v19 = vadd.f32 %v3465_v17, %v2701_v8  ;;  %v4417_v20 = vadd.f32 %v3547_v18, %v2709_v6  ;;  %v3467_v21 = vpop.f32.mrb[25].mxu0  ;;  %v3549_v22 = vpop.f32.mrb[25].mxu1 }
 0x6cc   :  { %v4416_v10 = vadd.f32 %v3467_v21, %v2705_v9  ;;  %v4418_v23 = vadd.f32 %v3549_v22, %v2713_v14  ;;  %v3469_v24 = vpop.f32.mrb[26].mxu0  ;;  %v3551_v25 = vpop.f32.mrb[26].mxu1 }
 0x6cd   :  { %v3554_v26 = vmax.f32 %v4415_v19, 0.0  ;;  %v3556_v27 = vmax.f32 %v4417_v20, 0.0  ;;  %v3470_v28 = vpop.f32.mrb[27].mxu0  ;;  %v3552_v12 = vpop.f32.mrb[27].mxu1 }
 0x6ce   :  { %v3555_v30 = vmax.f32 %v4416_v10, 0.0  ;;  %v3557_v13 = vmax.f32 %v4418_v23, 0.0 }
 0x6cf   :  { %v3558_v34 = vpack.c.bf16 %v3554_v26, %v3554_v26  ;;  %v3560_v16 = vpack.c.bf16 %v3556_v27, %v3556_v27 }
 0x6d0   :  { %v3559_v32 = vpack.c.bf16 %v3555_v30, %v3555_v30  ;;  %v3561_v15 = vpack.c.bf16 %v3557_v13, %v3557_v13 }
 0x6d2   :  { %3857 = vmatprep.mubr.bf16.mxu0 %v3559_v32  ;;  %3897 = vmatprep.mubr.bf16.mxu1 %v3561_v15 }
 0x6d3   :  { %3858 = vmatmul.mubr.bf16.vlgmr.msra.gmra.mrb[28].mxu0 %v3558_v34  ;;  %3898 = vmatmul.mubr.bf16.vlgmr.msra.gmra.mrb[28].mxu1 %v3560_v16 }
 0x7a6   :  { %v4371_v35 = vpop.f32.mrb[28].mxu0  ;;  %v4393_v36 = vpop.f32.mrb[28].mxu1 }
 0x7a7   :  { %v4372_v39 = vpop.f32.mrb[29].mxu0  ;;  %v4394_v41 = vpop.f32.mrb[29].mxu1 }
 0x7a8   :  { %v4373_v42 = vadd.f32 %v4372_v39, %v4371_v35  ;;  %v4395_v43 = vadd.f32 %v4394_v41, %v4393_v36  ;;  %v4374_v45 = vpop.f32.mrb[30].mxu0  ;;  %v4396_v46 = vpop.f32.mrb[30].mxu1 }
 0x7a9   :  { %v4375_v47 = vpop.f32.mrb[31].mxu0  ;;  %v4397_v48 = vpop.f32.mrb[31].mxu1 }
 0x7aa   :  { %v3860_v50 = vadd.f32 %v4373_v42, %v4322_v51 }
 0x7ac   :  { %v3900_v52 = vadd.f32 %v4395_v43, %v3860_v50 }
 0x7ae   :  { %3905 = vst [vmem:[#allocation13] sm:$0x3] %v3900_v52 }
 0x7af   :  { %5248 = shalt.err (!%p5245_p10)
}
 0x7b0   :  { %s5249_s17 = scalar_lea.hbm %s5535_s11, 32 }
 0x7b1   :  { %p5250_p11 = scmp.ne.s32.totalorder %s5535_s11, %s5249_s17  ;;  %p5253_p12 = scmp.lt.u32.totalorder %s5249_s17, %s5535_s11 }
 0x7b3   :  { %p5255_p13 = pnand %p5253_p12, %p5250_p11 }
 0x7b5   :  { %5258 = shalt.err (!%p5255_p13)
}
 0x7b6   :  { %3915 = dma.vmem_to_hbm [thread:$0]  %s3913_s16, 32, %s5535_s11, [#allocation4]  }
 0x7b7   :  { %5267 = dma.done.wait [#allocation4], 32  }
 0x7b8   :  { %5268 = vsyncadd [#allocation4], 4294967264 }
 0x7b9   :  { %3919 = vsyncpa [#allocation3], 1 }
 0x7ba   :  { %3920 = vsyncpa [#allocation6], 1 }
 0x7bb   :  { %3921 = vsyncpa [#allocation9], 1 }
 0x7bc   :  { %3922 = vsyncpa [#allocation12], 1 }
 0x7bd   :  { %3923 = vsyncpa [#allocation4], 1 }

</bundles_post_ra>
